<compile_context>
chip_gen: v7x
topology: tpu7x:2x2x1
jax: 0.10.0
libtpu: 0.0.40
codegen_flags: <defaults>
</compile_context>

<pallas_src>
import functools

import jax
import jax.numpy as jnp
from jax.experimental import pallas as pl
from jax.experimental.pallas import tpu as pltpu

C_FEAT = 32      # lift / splat feature channels
D_BINS = 8       # depth bins
C_TOT = C_FEAT + D_BINS
N_CLASSES = 200  # width of the fallback nn.Linear(enhanced_splat.shape[-1], 200)


# ---------------------------------------------------------------------------
# Per-generation budgets
# ---------------------------------------------------------------------------
@functools.lru_cache(maxsize=1)
def _device_budgets():
    """Return (vmem_limit_bytes, hw_tile_target) tuned per TPU generation."""
    vmem_phys = None
    try:
        info = pltpu.get_tpu_info()
        vmem_phys = getattr(info, "vmem_capacity_bytes", None)
    except Exception:
        vmem_phys = None
    if not vmem_phys:
        vmem_phys = 64 * 1024 * 1024          # conservative default (v7x)
    if vmem_phys >= 96 * 1024 * 1024:         # v5e / v6e: 128 MiB physical
        return 64 * 1024 * 1024, 8192
    return 40 * 1024 * 1024, 4096             # v7x: 64 MiB physical, headroom


def _pick_hw_tile(hw, target):
    """Largest lane tile <= target that is a multiple of 128 and divides HW;
    fall back to the full HW extent (always a legal block)."""
    if hw <= target:
        return hw
    t = (target // 128) * 128
    while t >= 128:
        if hw % t == 0:
            return t
        t -= 128
    # TODO(synk): pathological HW with no 128-multiple divisor <= target falls
    # back to a single full-extent tile (may need a larger vmem_limit).
    return hw


# ---------------------------------------------------------------------------
# Fused LSS + HMM kernel (lift + depth + splat + baseline head + enhancement)
# ---------------------------------------------------------------------------
def _lss_hmm_kernel(x_ref, w_ref, b_ref, whb_ref, gate_ref,
                    lift_ref, depth_ref, splat_ref, base_ref, enh_ref,
                    *, n_cams):
    """Grid = (B, HW_tiles, Ncam).  Channels on sublanes, pixels on lanes.

    Per (b, hw_tile, cam):
      proj  = W_proj @ x + b_proj           (C_TOT, T)  via unrolled VPU FMAs
      lift  = relu(proj[:C_FEAT])                        -> lift_ref (bf16)
      depth = softmax_bins(proj[C_FEAT:])                -> depth_ref (bf16)
      splat += lift / n_cams                (f32, resident over cam axis)
    At the last camera:
      base = sigmoid(sum_c w_head[c]*splat[c] + b_head)  -> base_ref (f32)
      enh  = splat * (1 + gate[b])                       -> enh_ref (bf16)
    """
    n = pl.program_id(2)

    x = x_ref[0, 0]                                   # (Cin, T) f32
    w = w_ref[...]                                    # (C_TOT, Cin)
    proj = b_ref[...]                                 # (C_TOT, 1) -> broadcast
    # Tiny Cin: unrolled VPU broadcast-FMAs; skips the <1%-utilised f32 MXU.
    for k in range(x.shape[0]):
        proj = proj + w[:, k:k + 1] * x[k:k + 1, :]   # (C_TOT, T)

    lift = jnp.maximum(proj[:C_FEAT, :], 0.0)         # (C_FEAT, T) f32
    lift_ref[0, 0] = lift.astype(lift_ref.dtype)

    # depth softmax over the bin axis (full D_BINS lives in this tile).
    dlog = proj[C_FEAT:C_TOT, :]
    dmax = jnp.max(dlog, axis=0, keepdims=True)
    dexp = jnp.exp(dlog - dmax)
    dinv = pl.reciprocal(jnp.sum(dexp, axis=0, keepdims=True), approx=True)
    depth_ref[0, 0] = (dexp * dinv).astype(depth_ref.dtype)

    # splat / bev_pool: camera-mean accumulated in the resident f32 out block.
    contrib = lift * (1.0 / n_cams)

    @pl.when(n == 0)
    def _init():
        splat_ref[0] = contrib

    @pl.when(n > 0)
    def _accum():
        splat_ref[0] = splat_ref[0] + contrib

    @pl.when(n == n_cams - 1)
    def _finalize():
        splat = splat_ref[0]                           # (C_FEAT, T) f32
        w_head = whb_ref[:C_FEAT, :]                   # (C_FEAT, 1)
        b_head = whb_ref[C_FEAT:C_FEAT + 1, :]         # (1, 1)
        # frozen baseline segmentation head: fused sublane dot-reduction.
        base = jax.nn.sigmoid(
            jnp.sum(splat * w_head, axis=0, keepdims=True) + b_head)
        base_ref[0] = base.astype(base_ref.dtype)
        # HMM enhancement: per-channel (1 + gate) row scale, fused on the VPU.
        enh_ref[0] = (splat * (1.0 + gate_ref[0])).astype(enh_ref.dtype)


def lss_hmm_fused(x, w_proj, b_proj, whb, gate_col, feature_dtype=jnp.bfloat16):
    """x: (B, N, Cin, HW) f32 images (free reshape of NCHW imgs).
    Returns (lift (B,N,C,HW) bf16, depth (B,N,D,HW) bf16, splat (B,C,HW) f32,
             base (B,1,HW) f32, enhanced (B,C,HW) bf16) - all NCHW-ready."""
    B, N, Cin, HW = x.shape
    vmem_limit, hw_target = _device_budgets()
    t_hw = _pick_hw_tile(HW, hw_target)
    n_hw = HW // t_hw

    kernel = functools.partial(_lss_hmm_kernel, n_cams=N)
    out_shape = (
        jax.ShapeDtypeStruct((B, N, C_FEAT, HW), feature_dtype),   # lift
        jax.ShapeDtypeStruct((B, N, D_BINS, HW), feature_dtype),   # depth
        jax.ShapeDtypeStruct((B, C_FEAT, HW), jnp.float32),        # splat (f32)
        jax.ShapeDtypeStruct((B, 1, HW), jnp.float32),             # base
        jax.ShapeDtypeStruct((B, C_FEAT, HW), feature_dtype),      # enhanced
    )
    return pl.pallas_call(
        kernel,
        out_shape=out_shape,
        grid_spec=pltpu.PrefetchScalarGridSpec(
            num_scalar_prefetch=0,
            # B and HW tiles parallel (feeds both v7x TCs even at B==1);
            # camera axis innermost + arbitrary (splat accumulator residency).
            grid=(B, n_hw, N),
            in_specs=[
                pl.BlockSpec((1, 1, Cin, t_hw), lambda b, h, n: (b, n, 0, h)),
                pl.BlockSpec((C_TOT, Cin), lambda b, h, n: (0, 0)),    # W_proj
                pl.BlockSpec((C_TOT, 1), lambda b, h, n: (0, 0)),      # b_proj
                pl.BlockSpec((C_FEAT + 1, 1), lambda b, h, n: (0, 0)),  # head w|b
                pl.BlockSpec((1, C_FEAT, 1), lambda b, h, n: (b, 0, 0)),  # gate
            ],
            out_specs=(
                pl.BlockSpec((1, 1, C_FEAT, t_hw), lambda b, h, n: (b, n, 0, h)),
                pl.BlockSpec((1, 1, D_BINS, t_hw), lambda b, h, n: (b, n, 0, h)),
                pl.BlockSpec((1, C_FEAT, t_hw), lambda b, h, n: (b, 0, h)),
                pl.BlockSpec((1, 1, t_hw), lambda b, h, n: (b, 0, h)),
                pl.BlockSpec((1, C_FEAT, t_hw), lambda b, h, n: (b, 0, h)),
            ),
        ),
        compiler_params=pltpu.CompilerParams(
            dimension_semantics=("parallel", "parallel", "arbitrary"),
            vmem_limit_bytes=vmem_limit,
        ),
    )(x, w_proj, b_proj, whb, gate_col)


# ---------------------------------------------------------------------------
# Final linear (fallback nn.Linear(Y, 200) on the last NCHW dim)
# ---------------------------------------------------------------------------
def _matmul_bias_kernel(x_ref, w_ref, b_ref, o_ref):
    x = x_ref[...].astype(jnp.float32)   # bf16 activations read, f32 compute
    acc = jnp.dot(x, w_ref[...], preferred_element_type=jnp.float32)
    o_ref[...] = (acc + b_ref[...]).astype(o_ref.dtype)


def _pick_row_tile(m, k, n, vmem_limit, x_bytes):
    """Largest-first row tile with a VMEM fit and >=2 grid steps (megacore)."""
    for t in (4096, 2048, 1024, 512, 256, 128, 64, 32, 16, 8):
        if t > m or m % t:
            continue
        if m // t < 2 and m > 8:
            continue  # keep >=2 steps so both v7x TensorCores get work
        fit = 2 * t * (k * x_bytes + n * 4) + 2 * k * n * 4 + n * 4
        if fit <= vmem_limit:
            return t
    return None


def final_linear(x2d, w, b):
    """y[M, N] = x[M, K] @ w[K, N] + b, row-tiled, parallel grid, f32 output."""
    vmem_limit, _ = _device_budgets()
    M, K = x2d.shape
    N = w.shape[1]
    x_bytes = x2d.dtype.itemsize
    tm = _pick_row_tile(M, K, N, vmem_limit, x_bytes)
    pad = 0
    if tm is None:
        # ragged M: pad rows to a VMEM-safe tile instead of one huge block.
        tm = 512
        while tm > 8 and 2 * tm * (K * x_bytes + N * 4) + 2 * K * N * 4 > vmem_limit:
            tm //= 2
        pad = (-M) % tm
        x2d = jnp.pad(x2d, ((0, pad), (0, 0)))
    m_pad = M + pad
    b2 = b.reshape(1, N).astype(jnp.float32)
    out = pl.pallas_call(
        _matmul_bias_kernel,
        out_shape=jax.ShapeDtypeStruct((m_pad, N), jnp.float32),
        grid_spec=pltpu.PrefetchScalarGridSpec(
            num_scalar_prefetch=0,
            grid=(m_pad // tm,),
            in_specs=[
                pl.BlockSpec((tm, K), lambda i: (i, 0)),
                pl.BlockSpec((K, N), lambda i: (0, 0)),
                pl.BlockSpec((1, N), lambda i: (0, 0)),
            ],
            out_specs=pl.BlockSpec((tm, N), lambda i: (i, 0)),
        ),
        compiler_params=pltpu.CompilerParams(
            dimension_semantics=("parallel",),
            vmem_limit_bytes=vmem_limit,
        ),
    )(x2d, w.astype(jnp.float32), b2)
    return out[:M] if pad else out


# ---------------------------------------------------------------------------
# Plain-JAX glue (exact port of torch _extract_actions)
# ---------------------------------------------------------------------------
def extract_actions(rots, trans):
    B = rots.shape[0]
    if rots.ndim >= 3:
        if rots.shape[1] > 1:
            rot_diff = rots[:, 1:] - rots[:, :-1]
        else:
            rot_diff = jnp.zeros_like(rots[:, :1])
        if trans.shape[1] > 1:
            trans_diff = trans[:, 1:] - trans[:, :-1]
        else:
            trans_diff = jnp.zeros_like(trans[:, :1])
        actions = jnp.concatenate(
            [rot_diff.reshape(B, -1)[:, :3], trans_diff.reshape(B, -1)[:, :3]],
            axis=-1,
        )
    else:
        actions = jnp.zeros((B, 6), rots.dtype)
    return actions


# ---------------------------------------------------------------------------
# Forward pass
# ---------------------------------------------------------------------------
def frozen_lss_with_hmm_forward(params, imgs, rots, trans, intrins,
                                post_rots, post_trans, binimgs):
    del intrins, post_rots, post_trans, binimgs  # unused in this forward, as in torch
    B, N, Cin, H, W = imgs.shape
    HW = H * W

    # TODO(synk): the real LSS backbone / HMMPlugin classes are not defined in
    # the reference snippet; deterministic 1x1-conv / gate stand-ins are used
    # (and PyTorch forward hooks are replaced by returning the features).

    # channels-as-rows view of the images; pure metadata reshape, no transpose.
    x = imgs.reshape(B, N, Cin, HW).astype(jnp.float32)

    # ---- actions + HMM state gate (tiny (B,6)x(6,32) matmul, plain JAX) ----
    actions = extract_actions(rots, trans)                           # (B, 6)
    gate = jax.nn.sigmoid(
        actions.astype(jnp.float32) @ params["w_act"] + params["b_act"])  # (B, C)
    gate_col = gate.reshape(B, C_FEAT, 1)

    # ---- consolidated tiny operands for the fused kernel ----
    w_proj = jnp.concatenate(
        [params["w_lift"].T, params["w_depth"].T], axis=0).astype(jnp.float32)
    b_proj = jnp.concatenate(
        [params["b_lift"], params["b_depth"]], axis=0).reshape(C_TOT, 1)
    whb = jnp.concatenate(
        [params["w_head"].reshape(C_FEAT), params["b_head"]],
        axis=0).reshape(C_FEAT + 1, 1).astype(jnp.float32)

    # ---- fused lift + depth + splat + baseline head + enhancement ----
    lift4, depth4, splat3, base3, enh3 = lss_hmm_fused(
        x, w_proj, b_proj.astype(jnp.float32), whb, gate_col)

    # module-boundary tensors: contiguous reshapes only (already NCHW).
    lift_features = lift4.reshape(B, N, C_FEAT, H, W)
    depth_features = depth4.reshape(B, N, D_BINS, H, W)
    splat_features = splat3.reshape(B, C_FEAT, H, W)
    lss_baseline_output = base3.reshape(B, 1, H, W)
    enhanced_splat = enh3.reshape(B, C_FEAT, H, W)
    hmm_outputs = {"enhanced_splat": enhanced_splat, "state_gate": gate}

    # ---- enhanced output: fallback nn.Linear(enhanced_splat.shape[-1], 200)
    # applied to the LAST dim (Y=W) of the NCHW splat, exactly like the torch
    # code.  (B, C, H*W) -> (B*C*H, W) is a free contiguous view.
    # TODO(synk): when W % 128 == 0 this linear could be fused into the kernel
    # finalize block to skip re-reading enhanced_splat from HBM; kept separate
    # here because W is not 128-aligned at these shapes.
    es2d = enh3.reshape(B * C_FEAT * H, W)
    enh_flat = final_linear(es2d, params["w_final"], params["b_final"])
    enhanced_output = enh_flat.reshape(B, C_FEAT, H, N_CLASSES)

    return {
        "lss_baseline_output": lss_baseline_output,
        "enhanced_output": enhanced_output,
        "hmm_outputs": hmm_outputs,
        "extracted_features": {
            "lift_features": lift_features,
            "splat_features": splat_features,
            "depth_features": depth_features,
        },
        "actions": actions,
    }


def init_params(key, c_in, last_dim):
    ks = jax.random.split(key, 5)
    nrm = lambda k, shape, s: s * jax.random.normal(k, shape, jnp.float32)
    return {
        "w_lift": nrm(ks[0], (c_in, C_FEAT), 0.5),
        "b_lift": jnp.zeros((C_FEAT,), jnp.float32),
        "w_depth": nrm(ks[1], (c_in, D_BINS), 0.5),
        "b_depth": jnp.zeros((D_BINS,), jnp.float32),
        "w_head": nrm(ks[2], (C_FEAT, 1), 0.2),
        "b_head": jnp.zeros((1,), jnp.float32),
        "w_act": nrm(ks[3], (6, C_FEAT), 0.3),
        "b_act": jnp.zeros((C_FEAT,), jnp.float32),
        "w_final": nrm(ks[4], (last_dim, N_CLASSES), 0.1),
        "b_final": jnp.zeros((N_CLASSES,), jnp.float32),
    }


# ---------------------------------------------------------------------------
# Plain-JAX reference of the same stand-in math (for a correctness check)
# ---------------------------------------------------------------------------
def _reference_forward(params, imgs, rots, trans):
    B, N, Cin, H, W = imgs.shape
    xr = jnp.transpose(imgs, (0, 1, 3, 4, 2)).reshape(B * N * H * W, Cin)
    lift = jax.nn.relu(xr @ params["w_lift"] + params["b_lift"])
    lift_features = jnp.transpose(lift.reshape(B, N, H, W, C_FEAT), (0, 1, 4, 2, 3))
    dep = jax.nn.softmax(xr @ params["w_depth"] + params["b_depth"], axis=-1)
    depth_features = jnp.transpose(dep.reshape(B, N, H, W, D_BINS), (0, 1, 4, 2, 3))
    splat = jnp.mean(lift_features, axis=1)
    sp_cl = jnp.transpose(splat, (0, 2, 3, 1)).reshape(B * H * W, C_FEAT)
    base = jax.nn.sigmoid(sp_cl @ params["w_head"] + params["b_head"])
    lss_base = jnp.transpose(base.reshape(B, H, W, 1), (0, 3, 1, 2))
    actions = extract_actions(rots, trans)
    gate = jax.nn.sigmoid(actions @ params["w_act"] + params["b_act"])
    enhanced = splat * (1.0 + gate[:, :, None, None])
    enh_out = (enhanced.reshape(B * C_FEAT * H, W) @ params["w_final"]
               + params["b_final"]).reshape(B, C_FEAT, H, N_CLASSES)
    return {
        "lss_baseline_output": lss_base,
        "enhanced_output": enh_out,
        "enhanced_splat": enhanced,
        "lift_features": lift_features,
        "splat_features": splat,
        "depth_features": depth_features,
    }


def _close(got, want, tol):
    return bool(jnp.allclose(got.astype(jnp.float32), want, rtol=tol, atol=tol))


if __name__ == "__main__":
    B, Ncam, Cin, H, W = 2, 3, 3, 16, 16
    key = jax.random.PRNGKey(0)
    k = jax.random.split(key, 8)
    imgs = jax.random.normal(k[0], (B, Ncam, Cin, H, W), jnp.float32)
    rots = jax.random.normal(k[1], (B, Ncam, 3, 3), jnp.float32)
    trans = jax.random.normal(k[2], (B, Ncam, 3), jnp.float32)
    intrins = jax.random.normal(k[3], (B, Ncam, 3, 3), jnp.float32)
    post_rots = jax.random.normal(k[4], (B, Ncam, 3, 3), jnp.float32)
    post_trans = jax.random.normal(k[5], (B, Ncam, 3), jnp.float32)
    binimgs = (jax.random.uniform(k[6], (B, 1, H, W)) > 0.5).astype(jnp.float32)

    params = init_params(k[7], Cin, W)

    fwd = jax.jit(frozen_lss_with_hmm_forward)
    out = fwd(params, imgs, rots, trans, intrins, post_rots, post_trans, binimgs)
    jax.block_until_ready(out)

    # shape checks
    assert out["lss_baseline_output"].shape == (B, 1, H, W)
    assert out["enhanced_output"].shape == (B, C_FEAT, H, N_CLASSES)
    assert out["hmm_outputs"]["enhanced_splat"].shape == (B, C_FEAT, H, W)
    assert out["extracted_features"]["lift_features"].shape == (B, Ncam, C_FEAT, H, W)
    assert out["extracted_features"]["depth_features"].shape == (B, Ncam, D_BINS, H, W)
    assert out["extracted_features"]["splat_features"].shape == (B, C_FEAT, H, W)
    assert out["actions"].shape == (B, 6)

    # numerics vs plain-JAX reference of the same stand-in math
    # (lift/depth/enhanced are stored bf16 by design -> looser tolerance)
    ref = _reference_forward(params, imgs, rots, trans)
    checks = [
        ("lift", out["extracted_features"]["lift_features"], ref["lift_features"], 2e-2),
        ("depth", out["extracted_features"]["depth_features"], ref["depth_features"], 1e-2),
        ("splat", out["extracted_features"]["splat_features"], ref["splat_features"], 2e-3),
        ("base", out["lss_baseline_output"], ref["lss_baseline_output"], 2e-3),
        ("enh_splat", out["hmm_outputs"]["enhanced_splat"], ref["enhanced_splat"], 2e-2),
        ("enh_out", out["enhanced_output"], ref["enhanced_output"], 3e-2),
    ]
    for name, got, want, tol in checks:
        assert _close(got, want, tol), f"mismatch: {name}"

    print("KERNEL_OK")
</pallas_src>

<mosaic_0001>
module attributes {stable_mosaic.version = 11 : i64} {
  func.func @_lss_hmm_kernel(%arg0: i32, %arg1: i32, %arg2: i32, %arg3: memref<1x1x3x256xf32, #tpu.memory_space<vmem>>, %arg4: memref<40x3xf32, #tpu.memory_space<vmem>>, %arg5: memref<40x1xf32, #tpu.memory_space<vmem>>, %arg6: memref<33x1xf32, #tpu.memory_space<vmem>>, %arg7: memref<1x32x1xf32, #tpu.memory_space<vmem>>, %arg8: memref<1x1x32x256xbf16, #tpu.memory_space<vmem>>, %arg9: memref<1x1x8x256xbf16, #tpu.memory_space<vmem>>, %arg10: memref<1x32x256xf32, #tpu.memory_space<vmem>>, %arg11: memref<1x1x256xf32, #tpu.memory_space<vmem>>, %arg12: memref<1x32x256xbf16, #tpu.memory_space<vmem>>) attributes {dimension_semantics = [#tpu.dimension_semantics<parallel>, #tpu.dimension_semantics<parallel>, #tpu.dimension_semantics<arbitrary>], iteration_bounds = array<i64: 2, 1, 3>, scalar_prefetch = 0 : i64, scratch_operands = 0 : i64, tpu.core_type = #tpu.core_type<tc>, window_params = [{transform_indices = @transform_0, window_bounds = array<i64: 1, 1, 3, 256>}, {pipeline_mode = #tpu.pipeline_mode<synchronous>, transform_indices = @transform_1, window_bounds = array<i64: 40, 3>}, {pipeline_mode = #tpu.pipeline_mode<synchronous>, transform_indices = @transform_2, window_bounds = array<i64: 40, 1>}, {pipeline_mode = #tpu.pipeline_mode<synchronous>, transform_indices = @transform_3, window_bounds = array<i64: 33, 1>}, {transform_indices = @transform_4, window_bounds = array<i64: 1, 32, 1>}, {transform_indices = @transform_5, window_bounds = array<i64: 1, 1, 32, 256>}, {transform_indices = @transform_6, window_bounds = array<i64: 1, 1, 8, 256>}, {transform_indices = @transform_7, window_bounds = array<i64: 1, 32, 256>}, {transform_indices = @transform_8, window_bounds = array<i64: 1, 1, 256>}, {transform_indices = @transform_9, window_bounds = array<i64: 1, 32, 256>}]} {
    %c0 = arith.constant 0 : index
    %c0_0 = arith.constant 0 : index
    %c0_1 = arith.constant 0 : index
    %c0_2 = arith.constant 0 : index
    %0 = vector.load %arg3[%c0, %c0_0, %c0_1, %c0_2] : memref<1x1x3x256xf32, #tpu.memory_space<vmem>>, vector<1x1x3x256xf32>
    %1 = vector.shape_cast %0 : vector<1x1x3x256xf32> to vector<3x256xf32>
    %c0_3 = arith.constant 0 : index
    %c0_4 = arith.constant 0 : index
    %2 = vector.load %arg4[%c0_3, %c0_4] : memref<40x3xf32, #tpu.memory_space<vmem>>, vector<40x3xf32>
    %c0_5 = arith.constant 0 : index
    %c0_6 = arith.constant 0 : index
    %3 = vector.load %arg5[%c0_5, %c0_6] : memref<40x1xf32, #tpu.memory_space<vmem>>, vector<40x1xf32>
    %4 = vector.extract_strided_slice %2 {offsets = [0, 0], sizes = [40, 1], strides = [1, 1]} : vector<40x3xf32> to vector<40x1xf32>
    %5 = vector.extract_strided_slice %1 {offsets = [0, 0], sizes = [1, 256], strides = [1, 1]} : vector<3x256xf32> to vector<1x256xf32>
    %6 = vector.broadcast %4 : vector<40x1xf32> to vector<40x256xf32>
    %7 = vector.broadcast %5 : vector<1x256xf32> to vector<40x256xf32>
    %8 = arith.mulf %6, %7 : vector<40x256xf32>
    %9 = vector.broadcast %3 : vector<40x1xf32> to vector<40x256xf32>
    %10 = arith.addf %9, %8 : vector<40x256xf32>
    %11 = vector.extract_strided_slice %2 {offsets = [0, 1], sizes = [40, 1], strides = [1, 1]} : vector<40x3xf32> to vector<40x1xf32>
    %12 = vector.extract_strided_slice %1 {offsets = [1, 0], sizes = [1, 256], strides = [1, 1]} : vector<3x256xf32> to vector<1x256xf32>
    %13 = vector.broadcast %11 : vector<40x1xf32> to vector<40x256xf32>
    %14 = vector.broadcast %12 : vector<1x256xf32> to vector<40x256xf32>
    %15 = arith.mulf %13, %14 : vector<40x256xf32>
    %16 = arith.addf %10, %15 : vector<40x256xf32>
    %17 = vector.extract_strided_slice %2 {offsets = [0, 2], sizes = [40, 1], strides = [1, 1]} : vector<40x3xf32> to vector<40x1xf32>
    %18 = vector.extract_strided_slice %1 {offsets = [2, 0], sizes = [1, 256], strides = [1, 1]} : vector<3x256xf32> to vector<1x256xf32>
    %19 = vector.broadcast %17 : vector<40x1xf32> to vector<40x256xf32>
    %20 = vector.broadcast %18 : vector<1x256xf32> to vector<40x256xf32>
    %21 = arith.mulf %19, %20 : vector<40x256xf32>
    %22 = arith.addf %16, %21 : vector<40x256xf32>
    %23 = vector.extract_strided_slice %22 {offsets = [0, 0], sizes = [32, 256], strides = [1, 1]} : vector<40x256xf32> to vector<32x256xf32>
    %cst = arith.constant 0.000000e+00 : f32
    %24 = vector.broadcast %cst : f32 to vector<32x256xf32>
    %25 = arith.maximumf %23, %24 : vector<32x256xf32>
    %26 = arith.truncf %25 : vector<32x256xf32> to vector<32x256xbf16>
    %c0_7 = arith.constant 0 : index
    %c0_8 = arith.constant 0 : index
    %c0_9 = arith.constant 0 : index
    %c0_10 = arith.constant 0 : index
    %27 = vector.load %arg8[%c0_7, %c0_8, %c0_9, %c0_10] : memref<1x1x32x256xbf16, #tpu.memory_space<vmem>>, vector<1x1x32x256xbf16>
    %28 = vector.shape_cast %27 : vector<1x1x32x256xbf16> to vector<32x256xbf16>
    %29 = vector.shape_cast %26 : vector<32x256xbf16> to vector<1x1x32x256xbf16>
    tpu.vector_store %arg8[%c0_7, %c0_8, %c0_9, %c0_10], %29 {strides = array<i32>} : memref<1x1x32x256xbf16, #tpu.memory_space<vmem>>, vector<1x1x32x256xbf16>,
    %30 = vector.extract_strided_slice %22 {offsets = [32, 0], sizes = [8, 256], strides = [1, 1]} : vector<40x256xf32> to vector<8x256xf32>
    %cst_11 = arith.constant dense<0xFF800000> : vector<256xf32>
    %31 = vector.multi_reduction <maximumf>, %30, %cst_11 [0] : vector<8x256xf32> to vector<256xf32>
    %32 = vector.shape_cast %31 : vector<256xf32> to vector<1x256xf32>
    %33 = vector.broadcast %32 : vector<1x256xf32> to vector<8x256xf32>
    %34 = arith.subf %30, %33 : vector<8x256xf32>
    %35 = math.exp %34 : vector<8x256xf32>
    %cst_12 = arith.constant dense<0.000000e+00> : vector<256xf32>
    %36 = vector.multi_reduction <add>, %35, %cst_12 [0] : vector<8x256xf32> to vector<256xf32>
    %37 = vector.shape_cast %36 : vector<256xf32> to vector<1x256xf32>
    %38 = tpu.reciprocal %37 {approx = true} : vector<1x256xf32> -> vector<1x256xf32>
    %39 = vector.broadcast %38 : vector<1x256xf32> to vector<8x256xf32>
    %40 = arith.mulf %35, %39 : vector<8x256xf32>
    %41 = arith.truncf %40 : vector<8x256xf32> to vector<8x256xbf16>
    %c0_13 = arith.constant 0 : index
    %c0_14 = arith.constant 0 : index
    %c0_15 = arith.constant 0 : index
    %c0_16 = arith.constant 0 : index
    %42 = vector.load %arg9[%c0_13, %c0_14, %c0_15, %c0_16] : memref<1x1x8x256xbf16, #tpu.memory_space<vmem>>, vector<1x1x8x256xbf16>
    %43 = vector.shape_cast %42 : vector<1x1x8x256xbf16> to vector<8x256xbf16>
    %44 = vector.shape_cast %41 : vector<8x256xbf16> to vector<1x1x8x256xbf16>
    tpu.vector_store %arg9[%c0_13, %c0_14, %c0_15, %c0_16], %44 {strides = array<i32>} : memref<1x1x8x256xbf16, #tpu.memory_space<vmem>>, vector<1x1x8x256xbf16>,
    %cst_17 = arith.constant 0.333333343 : f32
    %45 = vector.broadcast %cst_17 : f32 to vector<32x256xf32>
    %46 = arith.mulf %25, %45 : vector<32x256xf32>
    %c0_i32 = arith.constant 0 : i32
    %47 = arith.cmpi eq, %arg2, %c0_i32 : i32
    %48 = arith.extui %47 : i1 to i32
    %c0_i32_18 = arith.constant 0 : i32
    %49 = arith.cmpi ne, %48, %c0_i32_18 : i32
    scf.if %49 {
      %c0_22 = arith.constant 0 : index
      %c0_23 = arith.constant 0 : index
      %c0_24 = arith.constant 0 : index
      %56 = vector.load %arg10[%c0_22, %c0_23, %c0_24] : memref<1x32x256xf32, #tpu.memory_space<vmem>>, vector<1x32x256xf32>
      %57 = vector.shape_cast %56 : vector<1x32x256xf32> to vector<32x256xf32>
      %58 = vector.shape_cast %46 : vector<32x256xf32> to vector<1x32x256xf32>
      tpu.vector_store %arg10[%c0_22, %c0_23, %c0_24], %58 {strides = array<i32>} : memref<1x32x256xf32, #tpu.memory_space<vmem>>, vector<1x32x256xf32>,
    } else {
    }
    %c0_i32_19 = arith.constant 0 : i32
    %50 = arith.cmpi sgt, %arg2, %c0_i32_19 : i32
    %51 = arith.extui %50 : i1 to i32
    %c0_i32_20 = arith.constant 0 : i32
    %52 = arith.cmpi ne, %51, %c0_i32_20 : i32
    scf.if %52 {
      %c0_22 = arith.constant 0 : index
      %c0_23 = arith.constant 0 : index
      %c0_24 = arith.constant 0 : index
      %56 = vector.load %arg10[%c0_22, %c0_23, %c0_24] : memref<1x32x256xf32, #tpu.memory_space<vmem>>, vector<1x32x256xf32>
      %57 = vector.shape_cast %56 : vector<1x32x256xf32> to vector<32x256xf32>
      %58 = arith.addf %57, %46 : vector<32x256xf32>
      %c0_25 = arith.constant 0 : index
      %c0_26 = arith.constant 0 : index
      %c0_27 = arith.constant 0 : index
      %59 = vector.load %arg10[%c0_25, %c0_26, %c0_27] : memref<1x32x256xf32, #tpu.memory_space<vmem>>, vector<1x32x256xf32>
      %60 = vector.shape_cast %59 : vector<1x32x256xf32> to vector<32x256xf32>
      %61 = vector.shape_cast %58 : vector<32x256xf32> to vector<1x32x256xf32>
      tpu.vector_store %arg10[%c0_25, %c0_26, %c0_27], %61 {strides = array<i32>} : memref<1x32x256xf32, #tpu.memory_space<vmem>>, vector<1x32x256xf32>,
    } else {
    }
    %c2_i32 = arith.constant 2 : i32
    %53 = arith.cmpi eq, %arg2, %c2_i32 : i32
    %54 = arith.extui %53 : i1 to i32
    %c0_i32_21 = arith.constant 0 : i32
    %55 = arith.cmpi ne, %54, %c0_i32_21 : i32
    scf.if %55 {
      %c0_22 = arith.constant 0 : index
      %c0_23 = arith.constant 0 : index
      %c0_24 = arith.constant 0 : index
      %56 = vector.load %arg10[%c0_22, %c0_23, %c0_24] : memref<1x32x256xf32, #tpu.memory_space<vmem>>, vector<1x32x256xf32>
      %57 = vector.shape_cast %56 : vector<1x32x256xf32> to vector<32x256xf32>
      %c0_25 = arith.constant 0 : index
      %c0_26 = arith.constant 0 : index
      %58 = vector.load %arg6[%c0_25, %c0_26] : memref<33x1xf32, #tpu.memory_space<vmem>>, vector<32x1xf32>
      %c32 = arith.constant 32 : index
      %c0_27 = arith.constant 0 : index
      %59 = vector.load %arg6[%c32, %c0_27] : memref<33x1xf32, #tpu.memory_space<vmem>>, vector<1x1xf32>
      %60 = vector.broadcast %58 : vector<32x1xf32> to vector<32x256xf32>
      %61 = arith.mulf %57, %60 : vector<32x256xf32>
      %cst_28 = arith.constant dense<0.000000e+00> : vector<256xf32>
      %62 = vector.multi_reduction <add>, %61, %cst_28 [0] : vector<32x256xf32> to vector<256xf32>
      %63 = vector.shape_cast %62 : vector<256xf32> to vector<1x256xf32>
      %64 = vector.broadcast %59 : vector<1x1xf32> to vector<1x256xf32>
      %65 = arith.addf %63, %64 : vector<1x256xf32>
      %66 = arith.negf %65 : vector<1x256xf32>
      %67 = math.exp %66 : vector<1x256xf32>
      %cst_29 = arith.constant 1.000000e+00 : f32
      %68 = vector.broadcast %cst_29 : f32 to vector<1x256xf32>
      %69 = arith.addf %68, %67 : vector<1x256xf32>
      %70 = arith.divf %68, %69 : vector<1x256xf32>
      %c0_30 = arith.constant 0 : index
      %c0_31 = arith.constant 0 : index
      %c0_32 = arith.constant 0 : index
      %71 = vector.load %arg11[%c0_30, %c0_31, %c0_32] : memref<1x1x256xf32, #tpu.memory_space<vmem>>, vector<1x1x256xf32>
      %72 = vector.shape_cast %71 : vector<1x1x256xf32> to vector<1x256xf32>
      %73 = vector.shape_cast %70 : vector<1x256xf32> to vector<1x1x256xf32>
      tpu.vector_store %arg11[%c0_30, %c0_31, %c0_32], %73 {strides = array<i32>} : memref<1x1x256xf32, #tpu.memory_space<vmem>>, vector<1x1x256xf32>,
      %c0_33 = arith.constant 0 : index
      %c0_34 = arith.constant 0 : index
      %c0_35 = arith.constant 0 : index
      %74 = vector.load %arg7[%c0_33, %c0_34, %c0_35] : memref<1x32x1xf32, #tpu.memory_space<vmem>>, vector<1x32x1xf32>
      %75 = vector.shape_cast %74 : vector<1x32x1xf32> to vector<32x1xf32>
      %cst_36 = arith.constant 1.000000e+00 : f32
      %76 = vector.broadcast %cst_36 : f32 to vector<32x1xf32>
      %77 = arith.addf %76, %75 : vector<32x1xf32>
      %78 = vector.broadcast %77 : vector<32x1xf32> to vector<32x256xf32>
      %79 = arith.mulf %57, %78 : vector<32x256xf32>
      %80 = arith.truncf %79 : vector<32x256xf32> to vector<32x256xbf16>
      %c0_37 = arith.constant 0 : index
      %c0_38 = arith.constant 0 : index
      %c0_39 = arith.constant 0 : index
      %81 = vector.load %arg12[%c0_37, %c0_38, %c0_39] : memref<1x32x256xbf16, #tpu.memory_space<vmem>>, vector<1x32x256xbf16>
      %82 = vector.shape_cast %81 : vector<1x32x256xbf16> to vector<32x256xbf16>
      %83 = vector.shape_cast %80 : vector<32x256xbf16> to vector<1x32x256xbf16>
      tpu.vector_store %arg12[%c0_37, %c0_38, %c0_39], %83 {strides = array<i32>} : memref<1x32x256xbf16, #tpu.memory_space<vmem>>, vector<1x32x256xbf16>,
    } else {
    }
    return
  }
  func.func @transform_0(%arg0: i32, %arg1: i32, %arg2: i32) -> (i32, i32, i32, i32) {
    %c0_i32 = arith.constant 0 : i32
    %c0_i32_0 = arith.constant 0 : i32
    return %arg0, %arg2, %c0_i32, %arg1 : i32, i32, i32, i32
  }
  func.func @transform_1(%arg0: i32, %arg1: i32, %arg2: i32) -> (i32, i32) {
    %c0_i32 = arith.constant 0 : i32
    %c0_i32_0 = arith.constant 0 : i32
    %c0_i32_1 = arith.constant 0 : i32
    return %c0_i32, %c0_i32_0 : i32, i32
  }
  func.func @transform_2(%arg0: i32, %arg1: i32, %arg2: i32) -> (i32, i32) {
    %c0_i32 = arith.constant 0 : i32
    %c0_i32_0 = arith.constant 0 : i32
    %c0_i32_1 = arith.constant 0 : i32
    return %c0_i32, %c0_i32_0 : i32, i32
  }
  func.func @transform_3(%arg0: i32, %arg1: i32, %arg2: i32) -> (i32, i32) {
    %c0_i32 = arith.constant 0 : i32
    %c0_i32_0 = arith.constant 0 : i32
    %c0_i32_1 = arith.constant 0 : i32
    return %c0_i32, %c0_i32_0 : i32, i32
  }
  func.func @transform_4(%arg0: i32, %arg1: i32, %arg2: i32) -> (i32, i32, i32) {
    %c0_i32 = arith.constant 0 : i32
    %c0_i32_0 = arith.constant 0 : i32
    %c0_i32_1 = arith.constant 0 : i32
    return %arg0, %c0_i32, %c0_i32_0 : i32, i32, i32
  }
  func.func @transform_5(%arg0: i32, %arg1: i32, %arg2: i32) -> (i32, i32, i32, i32) {
    %c0_i32 = arith.constant 0 : i32
    %c0_i32_0 = arith.constant 0 : i32
    return %arg0, %arg2, %c0_i32, %arg1 : i32, i32, i32, i32
  }
  func.func @transform_6(%arg0: i32, %arg1: i32, %arg2: i32) -> (i32, i32, i32, i32) {
    %c0_i32 = arith.constant 0 : i32
    %c0_i32_0 = arith.constant 0 : i32
    return %arg0, %arg2, %c0_i32, %arg1 : i32, i32, i32, i32
  }
  func.func @transform_7(%arg0: i32, %arg1: i32, %arg2: i32) -> (i32, i32, i32) {
    %c0_i32 = arith.constant 0 : i32
    %c0_i32_0 = arith.constant 0 : i32
    return %arg0, %c0_i32, %arg1 : i32, i32, i32
  }
  func.func @transform_8(%arg0: i32, %arg1: i32, %arg2: i32) -> (i32, i32, i32) {
    %c0_i32 = arith.constant 0 : i32
    %c0_i32_0 = arith.constant 0 : i32
    return %arg0, %c0_i32, %arg1 : i32, i32, i32
  }
  func.func @transform_9(%arg0: i32, %arg1: i32, %arg2: i32) -> (i32, i32, i32) {
    %c0_i32 = arith.constant 0 : i32
    %c0_i32_0 = arith.constant 0 : i32
    return %arg0, %c0_i32, %arg1 : i32, i32, i32
  }
}

module attributes {stable_mosaic.version = 11 : i64} {
  func.func @_matmul_bias_kernel(%arg0: i32, %arg1: memref<512x16xbf16, #tpu.memory_space<vmem>>, %arg2: memref<16x200xf32, #tpu.memory_space<vmem>>, %arg3: memref<1x200xf32, #tpu.memory_space<vmem>>, %arg4: memref<512x200xf32, #tpu.memory_space<vmem>>) attributes {dimension_semantics = [#tpu.dimension_semantics<parallel>], iteration_bounds = array<i64: 2>, scalar_prefetch = 0 : i64, scratch_operands = 0 : i64, tpu.core_type = #tpu.core_type<tc>, window_params = [{transform_indices = @transform_0, window_bounds = array<i64: 512, 16>}, {pipeline_mode = #tpu.pipeline_mode<synchronous>, transform_indices = @transform_1, window_bounds = array<i64: 16, 200>}, {pipeline_mode = #tpu.pipeline_mode<synchronous>, transform_indices = @transform_2, window_bounds = array<i64: 1, 200>}, {transform_indices = @transform_3, window_bounds = array<i64: 512, 200>}]} {
    %c0 = arith.constant 0 : index
    %c0_0 = arith.constant 0 : index
    %0 = vector.load %arg1[%c0, %c0_0] : memref<512x16xbf16, #tpu.memory_space<vmem>>, vector<512x16xbf16>
    %1 = arith.extf %0 : vector<512x16xbf16> to vector<512x16xf32>
    %c0_1 = arith.constant 0 : index
    %c0_2 = arith.constant 0 : index
    %2 = vector.load %arg2[%c0_1, %c0_2] : memref<16x200xf32, #tpu.memory_space<vmem>>, vector<16x200xf32>
    %cst = arith.constant dense<0.000000e+00> : vector<512x200xf32>
    %3 = tpu.matmul %1, %2, %cst {dimension_numbers = #tpu.dot_dimension_numbers<[1], [0], [0], [1], [0, 0, 1, 1], [], []>} : vector<512x16xf32>, vector<16x200xf32>, vector<512x200xf32> -> vector<512x200xf32>
    %c0_3 = arith.constant 0 : index
    %c0_4 = arith.constant 0 : index
    %4 = vector.load %arg3[%c0_3, %c0_4] : memref<1x200xf32, #tpu.memory_space<vmem>>, vector<1x200xf32>
    %5 = vector.broadcast %4 : vector<1x200xf32> to vector<512x200xf32>
    %6 = arith.addf %3, %5 : vector<512x200xf32>
    %c0_5 = arith.constant 0 : index
    %c0_6 = arith.constant 0 : index
    %7 = vector.load %arg4[%c0_5, %c0_6] : memref<512x200xf32, #tpu.memory_space<vmem>>, vector<512x200xf32>
    tpu.vector_store %arg4[%c0_5, %c0_6], %6 {strides = array<i32>} : memref<512x200xf32, #tpu.memory_space<vmem>>, vector<512x200xf32>,
    return
  }
  func.func @transform_0(%arg0: i32) -> (i32, i32) {
    %c0_i32 = arith.constant 0 : i32
    %c0_i32_0 = arith.constant 0 : i32
    return %arg0, %c0_i32 : i32, i32
  }
  func.func @transform_1(%arg0: i32) -> (i32, i32) {
    %c0_i32 = arith.constant 0 : i32
    %c0_i32_0 = arith.constant 0 : i32
    %c0_i32_1 = arith.constant 0 : i32
    return %c0_i32, %c0_i32_0 : i32, i32
  }
  func.func @transform_2(%arg0: i32) -> (i32, i32) {
    %c0_i32 = arith.constant 0 : i32
    %c0_i32_0 = arith.constant 0 : i32
    %c0_i32_1 = arith.constant 0 : i32
    return %c0_i32, %c0_i32_0 : i32, i32
  }
  func.func @transform_3(%arg0: i32) -> (i32, i32) {
    %c0_i32 = arith.constant 0 : i32
    %c0_i32_0 = arith.constant 0 : i32
    return %arg0, %c0_i32 : i32, i32
  }
}

</mosaic_0001>

<bundles_post_ra>
// kernel: frozen_lss_with_hmm_forward.2
= control target key start
LH: loop header
LB: loop body
LE: loop exit
PB: predicated region body
PF: predicated region fallthrough
CT: control target
= control target key end

     0   :  { %s1587_s30 = smov 0   ;;  %s1589_s10 = smov 0   ;;  %s1838_s0 = inlined_call_operand.vmem [shape: f32[2,3,3,256], index: 0, kind: input, shape index: {}]   ;;  %s1839_s1 = inlined_call_operand.vmem [shape: f32[40,3], index: 1, kind: input, shape index: {}]   ;;  %s1840_s2 = inlined_call_operand.vmem [shape: f32[40,1], index: 2, kind: input, shape index: {}]   ;;  %s1841_s3 = inlined_call_operand.vmem [shape: f32[33,1], index: 3, kind: input, shape index: {}]   ;;  %s1842_s4 = inlined_call_operand.vmem [shape: f32[2,32,1], index: 4, kind: input, shape index: {}]   ;;  %s1843_s5 = inlined_call_operand.vmem [shape: bf16[2,3,32,256], index: 5, kind: output, shape index: {0}]   ;;  %s1844_s6 = inlined_call_operand.vmem [shape: bf16[2,3,8,256], index: 6, kind: output, shape index: {1}]   ;;  %s1845_s7 = inlined_call_operand.vmem [shape: f32[2,32,256], index: 7, kind: output, shape index: {2}]   ;;  %s1846_s8 = inlined_call_operand.vmem [shape: f32[2,1,256], index: 8, kind: output, shape index: {3}]   ;;  %s1847_s9 = inlined_call_operand.vmem [shape: bf16[2,32,256], index: 9, kind: output, shape index: {4}]  }
   0x1   :  { %1848 = sst [smem:[#allocation2_spill]] %s1842_s4  ;;  %s1591_s11 = smov 0  }
   0x2   :  { %s1593_s12 = smov 0   ;;  %s1595_s13 = smov 0  }
   0x3 LB: > { %s32_s14 = sadd.s32 1, %s1522_s11  ;;  %s39_s15 = sadd.s32 1, %s1526_s12  ;;  %s1530_s13 = sphi %s1595_s13, %s20_s13   ;;  %s1526_s12 = sphi %s1593_s12, %s1853_s12   ;;  %s1522_s11 = sphi %s1591_s11, %s1852_s11   ;;  %s1518_s10 = sphi %s1589_s10, %s1851_s10   ;;  %s1514_s30 = sphi %s1587_s30, %s1850_s30  }
   0x4   : > { %p33_p0 = scmp.ge.s32.totalorder %s32_s14, 3  ;;  %p1377_p1 = scmp.ge.s32.totalorder %s1530_s13, 1 }
   0x5   : > { %p352_p2 = scmp.lt.s32.totalorder %s1530_s13, 7 }
   0x6   : > { %s1855_s14 = smov (%p33_p0, %s32_s14), 0  ;;  %s1857_s15 = smov (!%p33_p0, %s39_s15), %s1526_s12 }
   0x7   : > { %p353_p3 = pnand %p1377_p1, %p352_p2  ;;  %p41_p4 = scmp.ge.s32.totalorder %s1857_s15, 2 }
   0x8   : > { %v529_v0 = vld [vmem:[%s1839_s1 + $0x20] sm:$0xff] (!%p353_p3)  ;;  %v1532_v1 = vmov (!%p353_p3), 1   ;;  %v1533_v2 = vmov (!%p353_p3), 0   ;;  %p449_p5 = scmp.lt.s32.totalorder (!%p353_p3), %s1518_s10, 1  ;;  %v1534_v4 = vmov (!%p353_p3), 2   ;;  %s1849_s4 = sld [smem:[#allocation2_spill]] (!%p353_p3)  ;;  %v561_v13 = vlaneseq (!%p353_p3) }
   0x9   : > { %s1859_s15 = smov (%p41_p4, %s1857_s15), 0  ;;  %356 = sbr.rel (%p353_p3) target bundleno = 406 (0x196), region = 40 }
   0xa   : > { %1467 = vset.pattern.permute.xlu1 (!%p353_p3), %v1532_v1  ;;  %1466 = vset.pattern.permute.xlu0 (!%p353_p3), %v1533_v2  ;;  %v534_v3 = vld [vmem:[%s1840_s2 + $0x20] sm:$0xff] (!%p353_p3)  ;;  %v526_v6 = vld [vmem:[%s1839_s1 + $0x8] sm:$0xff] (!%p353_p3)  ;;  %v527_v7 = vld [vmem:[%s1839_s1 + $0x10] sm:$0xff] (!%p353_p3)  ;;  %p451_p6 = scmp.lt.s32.totalorder (!%p353_p3), %s1514_s30, 2  ;;  %v1684_v14 = vshrl.u32 (!%p353_p3), %v561_v13, 7  ;;  %p1396_p7 = scmp.ne.s32.totalorder (!%p353_p3), %s1514_s30, 0 }
   0xb   : > { %641 = vperm.xlu1 (!%p353_p3), %1467, %v529_v0   ;;  %557 = vperm.xlu0 (!%p353_p3), %1466, %v529_v0   ;;  %v525_v5 = vld [vmem:[%s1839_s1] sm:$0xff] (!%p353_p3)  ;;  %v528_v8 = vld [vmem:[%s1839_s1 + $0x18] sm:$0xff] (!%p353_p3)  ;;  %v531_v10 = vld [vmem:[%s1840_s2 + $0x8] sm:$0xff] (!%p353_p3) }
   0xc   : > { %v530_v9 = vld [vmem:[%s1840_s2] sm:$0xff] (!%p353_p3)  ;;  %v532_v11 = vld [vmem:[%s1840_s2 + $0x10] sm:$0xff] (!%p353_p3)  ;;  %v533_v12 = vld [vmem:[%s1840_s2 + $0x18] sm:$0xff] (!%p353_p3)  ;;  %v563_v15 = vsub.s32 (!%p353_p3), 0, %v1684_v14  ;;  %v567_v16 = vsub.s32 (!%p353_p3), 4, %v1684_v14  ;;  %v646_v18 = vsub.s32 (!%p353_p3), 1, %v1684_v14 }
   0xd   : > { %v650_v19 = vsub.s32 (!%p353_p3), 5, %v1684_v14  ;;  %v704_v20 = vsub.s32 (!%p353_p3), 2, %v1684_v14  ;;  %v708_v21 = vsub.s32 (!%p353_p3), 6, %v1684_v14 }
   0xf   : > { %1468 = vset.pattern.permute.xlu1 (!%p353_p3), %v1534_v4  ;;  %611 = vperm.xlu0 (!%p353_p3), %1466, %v534_v3  }
  0x10   : > { %s1861_s10 = smov (!%p449_p5, %s1518_s10), 1  ;;  %699 = vperm.xlu1 %1468, %v529_v0  }
  0x11   : > { %s1407_s20 = sshll.u32 %s1861_s10, 5  ;;  %s1408_s26 = sshll.u32 %s1861_s10, 6 }
  0x12   : > { %s1631_s23 = scalar_lea.vmem %s1849_s4, %s1407_s20  ;;  %s1640_s29 = scalar_lea.vmem %s1845_s7, %s1408_s26 }
  0x13   : > { %537 = vperm.xlu0 %1466, %v525_v5   ;;  %s1388_s18 = sshll.u32 %s1861_s10, 1  ;;  %s1649_s22 = scalar_lea.vmem %s1847_s9, %s1407_s20 }
  0x14   : > { %1469 = vset.pattern.permute.xlu1 %v1533_v2  ;;  %s1657_s26 = scalar_lea.vmem %s1846_s8, %s1388_s18  ;;  %s1419_s28 = smul.u32 6, %s1861_s10 }
  0x15   : > { %542 = vperm.xlu1 %1469, %v526_v6   ;;  %s1676_s27 = scalar_select %p451_p6, %s1514_s30, 2 }
  0x16   : > { %s1420_s4 = smul.u32 24, %s1861_s10 }
  0x17   : > { %547 = vperm.xlu0 %1466, %v527_v7   ;;  %s1378_s16 = sshll.u32 %s1676_s27, 1  ;;  %s1382_s18 = sshll.u32 %s1676_s27, 3 }
  0x18   : > { %s1680_s17 = sadd.s32 %s1419_s28, %s1378_s16  ;;  %s1715_s10 = sadd.s32 %s1420_s4, %s1382_s18 }
  0x19   : > { %552 = vperm.xlu1 %1469, %v528_v8   ;;  %s1379_s19 = sshll.u32 %s1680_s17, 2  ;;  %s1383_s25 = sshll.u32 %s1715_s10, 2 }
  0x1a   : > { %s460_s24 = scalar_lea.vmem %s1838_s0, %s1379_s19  ;;  %s1736_s16 = scalar_lea.vmem %s1843_s5, %s1383_s25 }
  0x1b   : > { %591 = vperm.xlu0 %1466, %v530_v9   ;;  %v524_v17 = vld [vmem:[%s460_s24] sm:$0x77]  ;;  %s493_s24 = scalar_lea.vmem %s1844_s6, %s1379_s19 }
  0x1c   : > { %v564_v22 = vrot.slane %v524_v17, %v563_v15  ;;  %v568_v23 = vrot.slane %v524_v17, %v567_v16  ;;  %v647_v24 = vrot.slane %v524_v17, %v646_v18  ;;  %v651_v25 = vrot.slane %v524_v17, %v650_v19 }
  0x1d   : > { %596 = vperm.xlu1 %1469, %v531_v10   ;;  %v705_v26 = vrot.slane %v524_v17, %v704_v20  ;;  %v709_v27 = vrot.slane %v524_v17, %v708_v21 }
  0x1e   : > { %v574_v28 = vrot.slane %v564_v22, %v563_v15  ;;  %v578_v29 = vrot.slane %v568_v23, %v563_v15  ;;  %v1697_v32 = vrot.slane %v647_v24, %v646_v18  ;;  %v1699_v33 = vrot.slane %v651_v25, %v646_v18 }
  0x1f   : > { %601 = vperm.xlu0 %1466, %v532_v11   ;;  %v1701_v34 = vrot.slane %v705_v26, %v704_v20  ;;  %v1703_v35 = vrot.slane %v709_v27, %v704_v20 }
  0x21   : > { %606 = vperm.xlu1 %1469, %v533_v12  }
  0x23   : > { %1470 = vset.pattern.permute.xlu0 %v1532_v1 }
  0x24   : > { %625 = vperm.xlu0 %1470, %v525_v5  }
  0x25   : > { %1471 = vset.pattern.permute.xlu1 %v1532_v1 }
  0x26   : > { %629 = vperm.xlu1 %1471, %v526_v6  }
  0x28   : > { %637 = vperm.xlu0 %1470, %v528_v8  }
  0x2a   : > { %633 = vperm.xlu1 %1471, %v527_v7  }
  0x2c   : > { %1473 = vset.pattern.permute.xlu0 %v1534_v4 }
  0x2d   : > { %687 = vperm.xlu0 %1473, %v526_v6  }
  0x2e   : > { %1472 = vset.pattern.permute.xlu1 %v1534_v4 }
  0x2f   : > { %683 = vperm.xlu1 %1472, %v525_v5  }
  0x33   : > { %691 = vperm.xlu1 %1472, %v527_v7  }
  0x37   : > { %695 = vperm.xlu1 %1472, %v528_v8  }
  0x8a   : > { %v558_v30 = vpop.permute.xlu0 %557  ;;  %v642_v31 = vpop.permute.xlu1 %641 }
  0x8b   : > { %v587_v36 = vmul.f32 %v574_v28, %v558_v30  ;;  %v588_v37 = vmul.f32 %v578_v29, %v558_v30  ;;  %v670_v39 = vmul.f32 %v1697_v32, %v642_v31  ;;  %v671_v40 = vmul.f32 %v1699_v33, %v642_v31 }
  0x8e   : > { %v612_v38 = vpop.permute.xlu0 %611 }
  0x8f   : > { %v622_v41 = vadd.f32 %v612_v38, %v587_v36  ;;  %v623_v42 = vadd.f32 %v612_v38, %v588_v37  ;;  %v700_v43 = vpop.permute.xlu1 %699 }
  0x90   : > { %v728_v44 = vmul.f32 %v1701_v34, %v700_v43  ;;  %v729_v45 = vmul.f32 %v1703_v35, %v700_v43 }
  0x91   : > { %v680_v46 = vadd.f32 %v670_v39, %v622_v41  ;;  %v681_v47 = vadd.f32 %v671_v40, %v623_v42 }
  0x92   : > { %v538_v48 = vpop.permute.xlu0 %537 }
  0x93   : > { %v738_v49 = vadd.f32 %v728_v44, %v680_v46  ;;  %v739_v50 = vadd.f32 %v729_v45, %v681_v47  ;;  %v579_v17 = vmul.f32 %v574_v28, %v538_v48  ;;  %v580_v18 = vmul.f32 %v578_v29, %v538_v48 }
  0x94   : > { %v543_v51 = vpop.permute.xlu1 %542 }
  0x95   : > { %v776_v52 = vrot.slane %v738_v49, 4  ;;  %v782_v53 = vrot.slane %v739_v50, 4  ;;  %v581_v12 = vmul.f32 %v574_v28, %v543_v51  ;;  %v582_v15 = vmul.f32 %v578_v29, %v543_v51 }
  0x96   : > { %v548_v54 = vpop.permute.xlu0 %547 }
  0x97   : > { %v777_v55 = vmax.f32 %v738_v49, %v776_v52  ;;  %v783_v56 = vmax.f32 %v739_v50, %v782_v53  ;;  %v583_v19 = vmul.f32 %v574_v28, %v548_v54  ;;  %v584_v23 = vmul.f32 %v578_v29, %v548_v54 }
  0x98   : > { %v553_v57 = vpop.permute.xlu1 %552 }
  0x99   : > { %v778_v58 = vrot.slane %v777_v55, 2  ;;  %v784_v59 = vrot.slane %v783_v56, 2  ;;  %v585_v24 = vmul.f32 %v574_v28, %v553_v57  ;;  %v586_v25 = vmul.f32 %v578_v29, %v553_v57 }
  0x9a   : > { %v592_v60 = vpop.permute.xlu0 %591 }
  0x9b   : > { %v779_v61 = vmax.f32 %v777_v55, %v778_v58  ;;  %v785_v62 = vmax.f32 %v783_v56, %v784_v59  ;;  %v614_v27 = vadd.f32 %v592_v60, %v579_v17  ;;  %v615_v36 = vadd.f32 %v592_v60, %v580_v18 }
  0x9c   : > { %v597_v63 = vpop.permute.xlu1 %596 }
  0x9d   : > { %v780_v0 = vrot.slane %v779_v61, 1  ;;  %v786_v1 = vrot.slane %v785_v62, 1  ;;  %v616_v30 = vadd.f32 %v597_v63, %v581_v12  ;;  %v617_v31 = vadd.f32 %v597_v63, %v582_v15 }
  0x9e   : > { %v602_v2 = vpop.permute.xlu0 %601 }
  0x9f   : > { %v781_v3 = vmax.f32 %v779_v61, %v780_v0  ;;  %v787_v4 = vmax.f32 %v785_v62, %v786_v1  ;;  %v618_v37 = vadd.f32 %v602_v2, %v583_v19  ;;  %v619_v38 = vadd.f32 %v602_v2, %v584_v23 }
  0xa0   : > { %v607_v5 = vpop.permute.xlu1 %606 }
  0xa1   : > { %v788_v6 = vsub.f32 %v738_v49, %v781_v3  ;;  %v789_v7 = vsub.f32 %v739_v50, %v787_v4  ;;  %v620_v29 = vadd.f32 %v607_v5, %v585_v24  ;;  %v621_v44 = vadd.f32 %v607_v5, %v586_v25 }
  0xa3   : > { %v790_v8 = vmul.f32 1.442695, %v788_v6  ;;  %v792_v9 = vmul.f32 1.442695, %v789_v7  ;;  %v626_v10 = vpop.permute.xlu0 %625 }
  0xa4   : > { %v662_v26 = vmul.f32 %v1697_v32, %v626_v10  ;;  %v663_v39 = vmul.f32 %v1699_v33, %v626_v10 }
  0xa5   : > { %1474 = vpow2.f32 %v790_v8  ;;  %v630_v11 = vpop.permute.xlu1 %629 }
  0xa6   : > { %1476 = vpow2.f32 %v792_v9  ;;  %v664_v20 = vmul.f32 %v1697_v32, %v630_v11  ;;  %v665_v21 = vmul.f32 %v1699_v33, %v630_v11  ;;  %v672_v45 = vadd.f32 %v662_v26, %v614_v27 }
  0xa7   : > { %v638_v16 = vpop.permute.xlu0 %637  ;;  %v673_v55 = vadd.f32 %v663_v39, %v615_v36 }
  0xa8   : > { %v674_v41 = vadd.f32 %v664_v20, %v616_v30  ;;  %v675_v42 = vadd.f32 %v665_v21, %v617_v31  ;;  %v668_v46 = vmul.f32 %v1697_v32, %v638_v16  ;;  %v669_v63 = vmul.f32 %v1699_v33, %v638_v16 }
  0xa9   : > { %v634_v22 = vpop.permute.xlu1 %633 }
  0xaa   : > { %v666_v56 = vmul.f32 %v1697_v32, %v634_v22  ;;  %v667_v57 = vmul.f32 %v1699_v33, %v634_v22  ;;  %v678_v0 = vadd.f32 %v668_v46, %v620_v29  ;;  %v679_v25 = vadd.f32 %v669_v63, %v621_v44 }
  0xac   : > { %v688_v40 = vpop.permute.xlu0 %687  ;;  %v676_v10 = vadd.f32 %v666_v56, %v618_v37  ;;  %v677_v11 = vadd.f32 %v667_v57, %v619_v38 }
  0xad   : > { %v722_v43 = vmul.f32 %v1701_v34, %v688_v40  ;;  %v723_v28 = vmul.f32 %v1703_v35, %v688_v40 }
  0xae   : > { %v684_v47 = vpop.permute.xlu1 %683 }
  0xaf   : > { %v1720_v48 = vpop.eup %1474  ;;  %v732_v49 = vadd.f32 %v722_v43, %v674_v41  ;;  %v733_v50 = vadd.f32 %v723_v28, %v675_v42  ;;  %v720_v51 = vmul.f32 %v1701_v34, %v684_v47  ;;  %v721_v52 = vmul.f32 %v1703_v35, %v684_v47 }
  0xb0   : > { %v1725_v53 = vpop.eup %1476  ;;  %v794_v54 = vrot.slane %v1720_v48, 4 }
  0xb1   : > { %v800_v58 = vrot.slane %v1725_v53, 4  ;;  %v742_v59 = vmax.f32 %v732_v49, 0.0  ;;  %v743_v60 = vmax.f32 %v733_v50, 0.0  ;;  %v730_v61 = vadd.f32 %v720_v51, %v672_v45 }
  0xb2   : > { %v795_v62 = vadd.f32 %v1720_v48, %v794_v54  ;;  %v731_v1 = vadd.f32 %v721_v52, %v673_v55  ;;  %v692_v32 = vpop.permute.xlu1 %691 }
  0xb3   : > { %v801_v2 = vadd.f32 %v1725_v53, %v800_v58  ;;  %v1411_v3 = vpack.c.bf16 %v743_v60, %v742_v59  ;;  %v1739_v4 = vmul.f32 0.33333334, %v742_v59  ;;  %v1741_v5 = vmul.f32 0.33333334, %v743_v60 }
  0xb4   : > { %v796_v6 = vrot.slane %v795_v62, 2  ;;  %v740_v7 = vmax.f32 %v730_v61, 0.0  ;;  %v741_v8 = vmax.f32 %v731_v1, 0.0  ;;  %v724_v33 = vmul.f32 %v1701_v34, %v692_v32 }
  0xb5   : > { %v802_v9 = vrot.slane %v801_v2, 2  ;;  %773 = vst [vmem:[%s1736_s16 + $0x8] sm:$0xff] %v1411_v3  ;;  %v725_v12 = vmul.f32 %v1703_v35, %v692_v32  ;;  %833 = vst [vmem:[%s1640_s29 + $0x10] sm:$0xff] (!%p1396_p7), %v1739_v4 }
  0xb6   : > { %v797_v15 = vadd.f32 %v796_v6, %v795_v62  ;;  %v1410_v16 = vpack.c.bf16 %v741_v8, %v740_v7  ;;  %v819_v17 = vmul.f32 0.33333334, %v740_v7  ;;  %v820_v18 = vmul.f32 0.33333334, %v741_v8  ;;  %v696_v19 = vpop.permute.xlu1 %695  ;;  %834 = vst [vmem:[%s1640_s29 + $0x18] sm:$0xff] (!%p1396_p7), %v1741_v5 }
  0xb7   : > { %v803_v20 = vadd.f32 %v802_v9, %v801_v2  ;;  %v734_v21 = vadd.f32 %v724_v33, %v676_v10  ;;  %v735_v22 = vadd.f32 %v725_v12, %v677_v11  ;;  %v726_v23 = vmul.f32 %v1701_v34, %v696_v19 }
  0xb8   : > { %v798_v24 = vrot.slane %v797_v15, 1  ;;  %772 = vst [vmem:[%s1736_s16] sm:$0xff] %v1410_v16  ;;  %v727_v26 = vmul.f32 %v1703_v35, %v696_v19  ;;  %831 = vst [vmem:[%s1640_s29] sm:$0xff] (!%p1396_p7), %v819_v17 }
  0xb9   : > { %v804_v27 = vrot.slane %v803_v20, 1  ;;  %v744_v30 = vmax.f32 %v734_v21, 0.0  ;;  %v745_v31 = vmax.f32 %v735_v22, 0.0  ;;  %v736_v36 = vadd.f32 %v726_v23, %v678_v0  ;;  %832 = vst [vmem:[%s1640_s29 + $0x8] sm:$0xff] (!%p1396_p7), %v820_v18 }
  0xba   : > { %v799_v37 = vadd.f32 %v798_v24, %v797_v15  ;;  %v737_v38 = vadd.f32 %v727_v26, %v679_v25 }
  0xbb   : > { %v805_v39 = vadd.f32 %v804_v27, %v803_v20  ;;  %v1412_v40 = vpack.c.bf16 %v745_v31, %v744_v30  ;;  %v823_v41 = vmul.f32 0.33333334, %v744_v30  ;;  %v824_v42 = vmul.f32 0.33333334, %v745_v31 }
  0xbc   : > { %1478 = vrcp.f32 %v799_v37  ;;  %v746_v34 = vmax.f32 %v736_v36, 0.0  ;;  %v747_v43 = vmax.f32 %v737_v38, 0.0 }
  0xbd   : > { %1480 = vrcp.f32 %v805_v39  ;;  %774 = vst [vmem:[%s1736_s16 + $0x10] sm:$0xff] %v1412_v40  ;;  %835 = vst [vmem:[%s1640_s29 + $0x20] sm:$0xff] (!%p1396_p7), %v823_v41 }
  0xbe   : > { %v1413_v28 = vpack.c.bf16 %v747_v43, %v746_v34  ;;  %v825_v29 = vmul.f32 0.33333334, %v746_v34  ;;  %v826_v35 = vmul.f32 0.33333334, %v747_v43  ;;  %836 = vst [vmem:[%s1640_s29 + $0x28] sm:$0xff] (!%p1396_p7), %v824_v42 }
  0xc0   : > { %775 = vst [vmem:[%s1736_s16 + $0x18] sm:$0xff] %v1413_v28  ;;  %837 = vst [vmem:[%s1640_s29 + $0x30] sm:$0xff] (!%p1396_p7), %v825_v29 }
  0xc1   : > { %838 = vst [vmem:[%s1640_s29 + $0x38] sm:$0xff] (!%p1396_p7), %v826_v35 }
  0xc6   : > { %v1479_v44 = vpop.eup %1478  ;;  %830 = sbr.rel (%p1396_p7) target bundleno = 205 (0xcd), region = 44 }
  0xc7   : > { %v1481_v45 = vpop.eup %1480  ;;  %v808_v46 = vmul.f32 %v1479_v44, %v1720_v48 }
  0xc8   : > { %v809_v47 = vmul.f32 %v1481_v45, %v1725_v53 }
  0xca   : > { %v1414_v49 = vpack.c.bf16 %v809_v47, %v808_v46 }
  0xcc   : > { %818 = vst [vmem:[%s493_s24] sm:$0xff] %v1414_v49 }
  0xcd PF: > { %p1397_p8 = scmp.le.s32.totalorder %s1514_s30, 0 }
  0xce   : > { %v843_v48 = vld [vmem:[%s1640_s29] sm:$0xff] (!%p1397_p8)  ;;  %v844_v50 = vld [vmem:[%s1640_s29 + $0x8] sm:$0xff] (!%p1397_p8)  ;;  %v845_v51 = vld [vmem:[%s1640_s29 + $0x10] sm:$0xff] (!%p1397_p8) }
  0xcf   : > { %842 = sbr.rel (%p1397_p8) target bundleno = 214 (0xd6), region = 48  ;;  %v851_v52 = vadd.f32 (!%p1397_p8), %v843_v48, %v819_v17  ;;  %v852_v53 = vadd.f32 (!%p1397_p8), %v844_v50, %v820_v18  ;;  %v853_v54 = vadd.f32 (!%p1397_p8), %v845_v51, %v1739_v4  ;;  %v846_v55 = vld [vmem:[%s1640_s29 + $0x18] sm:$0xff] (!%p1397_p8)  ;;  %v847_v56 = vld [vmem:[%s1640_s29 + $0x20] sm:$0xff] (!%p1397_p8)  ;;  %v848_v57 = vld [vmem:[%s1640_s29 + $0x28] sm:$0xff] (!%p1397_p8) }
  0xd0   : > { %v854_v58 = vadd.f32 (!%p1397_p8), %v846_v55, %v1741_v5  ;;  %v855_v59 = vadd.f32 (!%p1397_p8), %v847_v56, %v823_v41  ;;  %v856_v60 = vadd.f32 (!%p1397_p8), %v848_v57, %v824_v42  ;;  %v849_v61 = vld [vmem:[%s1640_s29 + $0x30] sm:$0xff] (!%p1397_p8)  ;;  %v850_v62 = vld [vmem:[%s1640_s29 + $0x38] sm:$0xff] (!%p1397_p8) }
  0xd1   : > { %859 = vst [vmem:[%s1640_s29] sm:$0xff] (!%p1397_p8), %v851_v52  ;;  %860 = vst [vmem:[%s1640_s29 + $0x8] sm:$0xff] (!%p1397_p8), %v852_v53  ;;  %v857_v63 = vadd.f32 (!%p1397_p8), %v849_v61, %v825_v29  ;;  %v858_v0 = vadd.f32 (!%p1397_p8), %v850_v62, %v826_v35 }
  0xd2   : > { %861 = vst [vmem:[%s1640_s29 + $0x10] sm:$0xff] (!%p1397_p8), %v853_v54  ;;  %862 = vst [vmem:[%s1640_s29 + $0x18] sm:$0xff] (!%p1397_p8), %v854_v58 }
  0xd3   : > { %863 = vst [vmem:[%s1640_s29 + $0x20] sm:$0xff] (!%p1397_p8), %v855_v59  ;;  %864 = vst [vmem:[%s1640_s29 + $0x28] sm:$0xff] (!%p1397_p8), %v856_v60 }
  0xd4   : > { %865 = vst [vmem:[%s1640_s29 + $0x30] sm:$0xff] (!%p1397_p8), %v857_v63  ;;  %866 = vst [vmem:[%s1640_s29 + $0x38] sm:$0xff] (!%p1397_p8), %v858_v0 }
  0xd6 PF: > { %p1398_p9 = scmp.ne.s32.totalorder %s1514_s30, 2 }
  0xd7   : > { %v881_v1 = vld [vmem:[%s1841_s3 + $0x10] sm:$0xff] (!%p1398_p9)  ;;  %v879_v32 = vld [vmem:[%s1841_s3] sm:$0xff] (!%p1398_p9)  ;;  %v1535_v2 = vmov (!%p1398_p9), 0   ;;  %v882_v3 = vld [vmem:[%s1841_s3 + $0x18] sm:$0xff] (!%p1398_p9)  ;;  %vm969_vm0 = vcmp.lt.s32.totalorder (!%p1398_p9), %v561_v13, 256 }
  0xd8   : > { %870 = sbr.rel (%p1398_p9) target bundleno = 406 (0x196), region = 52  ;;  %1483 = vset.pattern.permute.xlu1 (!%p1398_p9), %v1535_v2  ;;  %1482 = vset.pattern.permute.xlu0 (!%p1398_p9), %v1535_v2  ;;  %v880_v4 = vld [vmem:[%s1841_s3 + $0x8] sm:$0xff] (!%p1398_p9)  ;;  %v972_v5 = vld [vmem:[%s1631_s23] sm:$0xff] (!%p1398_p9)  ;;  %v974_v8 = vld [vmem:[%s1631_s23 + $0x10] sm:$0xff] (!%p1398_p9) }
  0xd9   : > { %896 = vperm.xlu1 (!%p1398_p9), %1483, %v881_v1   ;;  %886 = vperm.xlu0 (!%p1398_p9), %1482, %v879_v32   ;;  %v976_v6 = vadd.f32 (!%p1398_p9), 1.0, %v972_v5  ;;  %v883_v7 = vld [vmem:[%s1841_s3 + $0x20] sm:$0x1] (!%p1398_p9)  ;;  %v973_v33 = vld [vmem:[%s1631_s23 + $0x8] sm:$0xff] (!%p1398_p9)  ;;  %v978_v9 = vadd.f32 (!%p1398_p9), 1.0, %v974_v8  ;;  %v975_v11 = vld [vmem:[%s1631_s23 + $0x18] sm:$0xff] (!%p1398_p9) }
  0xda   : > { %v977_v10 = vadd.f32 (!%p1398_p9), 1.0, %v973_v33  ;;  %v979_v12 = vadd.f32 (!%p1398_p9), 1.0, %v975_v11  ;;  %v871_v17 = vld [vmem:[%s1640_s29] sm:$0xff] (!%p1398_p9)  ;;  %v872_v18 = vld [vmem:[%s1640_s29 + $0x8] sm:$0xff] (!%p1398_p9)  ;;  %v873_v19 = vld [vmem:[%s1640_s29 + $0x10] sm:$0xff] (!%p1398_p9) }
  0xdb   : > { %v874_v20 = vld [vmem:[%s1640_s29 + $0x18] sm:$0xff] (!%p1398_p9)  ;;  %v875_v23 = vld [vmem:[%s1640_s29 + $0x20] sm:$0xff] (!%p1398_p9)  ;;  %v876_v24 = vld [vmem:[%s1640_s29 + $0x28] sm:$0xff] (!%p1398_p9) }
  0xdc   : > { %v877_v31 = vld [vmem:[%s1640_s29 + $0x30] sm:$0xff] (!%p1398_p9)  ;;  %v878_v36 = vld [vmem:[%s1640_s29 + $0x38] sm:$0xff] (!%p1398_p9) }
  0xdd   : > { %901 = vperm.xlu1 (!%p1398_p9), %1483, %v882_v3   ;;  %891 = vperm.xlu0 (!%p1398_p9), %1482, %v880_v4  }
  0xe1   : > { %982 = vperm.xlu1 %1483, %v976_v6   ;;  %932 = vperm.xlu0 %1482, %v883_v7  }
  0xe5   : > { %992 = vperm.xlu1 %1483, %v978_v9   ;;  %987 = vperm.xlu0 %1482, %v977_v10  }
  0xe9   : > { %997 = vperm.xlu0 %1482, %v979_v12  }
 0x158   : > { %v897_v15 = vpop.permute.xlu1 %896  ;;  %v887_v16 = vpop.permute.xlu0 %886 }
 0x159   : > { %v904_v25 = vmul.f32 %v887_v16, %v871_v17  ;;  %v905_v26 = vmul.f32 %v887_v16, %v872_v18  ;;  %v908_v39 = vmul.f32 %v897_v15, %v875_v23  ;;  %v909_v40 = vmul.f32 %v897_v15, %v876_v24 }
 0x15a   : > { %v1536_v16 = vmov 1966171168  }
 0x15c   : > { %v902_v21 = vpop.permute.xlu1 %901  ;;  %v892_v22 = vpop.permute.xlu0 %891 }
 0x15d   : > { %v906_v27 = vmul.f32 %v892_v22, %v873_v19  ;;  %v907_v30 = vmul.f32 %v892_v22, %v874_v20  ;;  %v910_v34 = vmul.f32 %v902_v21, %v877_v31  ;;  %v911_v43 = vmul.f32 %v902_v21, %v878_v36 }
 0x15f   : > { %v912_v37 = vadd.f32 %v906_v27, %v904_v25  ;;  %v921_v38 = vadd.f32 %v907_v30, %v905_v26 }
 0x160   : > { %v983_v41 = vpop.permute.xlu1 %982  ;;  %v933_v42 = vpop.permute.xlu0 %932 }
 0x161   : > { %v1000_v28 = vmul.f32 %v983_v41, %v871_v17  ;;  %v1001_v29 = vmul.f32 %v983_v41, %v872_v18  ;;  %v913_v35 = vadd.f32 %v912_v37, %v908_v39  ;;  %v922_v44 = vadd.f32 %v921_v38, %v909_v40 }
 0x162   : > { %v953_v17 = vunpack.c.l.s4 %v1536_v16 }
 0x163   : > { %v1415_v45 = vpack.c.bf16 %v1001_v29, %v1000_v28  ;;  %v914_v46 = vadd.f32 %v913_v35, %v910_v34  ;;  %v923_v47 = vadd.f32 %v922_v44, %v911_v43 }
 0x164   : > { %v993_v49 = vpop.permute.xlu1 %992  ;;  %v988_v48 = vpop.permute.xlu0 %987  ;;  %v954_v18 = vunpack.c.0.s8 %v953_v17 }
 0x165   : > { %1032 = vst [vmem:[%s1649_s22] sm:$0xff] %v1415_v45  ;;  %v1004_v50 = vmul.f32 %v993_v49, %v875_v23  ;;  %v1005_v51 = vmul.f32 %v993_v49, %v876_v24  ;;  %v1002_v52 = vmul.f32 %v988_v48, %v873_v19  ;;  %v1003_v53 = vmul.f32 %v988_v48, %v874_v20 }
 0x166   : > { %v915_v54 = vrot.slane %v914_v46, 4  ;;  %v924_v55 = vrot.slane %v923_v47, 4  ;;  %v957_v20 = vsub.s32 %v954_v18, %v1684_v14 }
 0x167   : > { %v1417_v56 = vpack.c.bf16 %v1005_v51, %v1004_v50  ;;  %v1416_v57 = vpack.c.bf16 %v1003_v53, %v1002_v52 }
 0x168   : > { %v998_v58 = vpop.permute.xlu0 %997  ;;  %v916_v59 = vadd.f32 %v915_v54, %v914_v46  ;;  %v925_v60 = vadd.f32 %v924_v55, %v923_v47 }
 0x169   : > { %1034 = vst [vmem:[%s1649_s22 + $0x10] sm:$0xff] %v1417_v56  ;;  %1033 = vst [vmem:[%s1649_s22 + $0x8] sm:$0xff] %v1416_v57  ;;  %v1006_v61 = vmul.f32 %v998_v58, %v877_v31  ;;  %v1007_v62 = vmul.f32 %v998_v58, %v878_v36 }
 0x16a   : > { %v917_v63 = vrot.slane %v916_v59, 2  ;;  %v926_v0 = vrot.slane %v925_v60, 2 }
 0x16b   : > { %v1418_v1 = vpack.c.bf16 %v1007_v62, %v1006_v61 }
 0x16c   : > { %v918_v32 = vadd.f32 %v917_v63, %v916_v59  ;;  %v927_v2 = vadd.f32 %v926_v0, %v925_v60 }
 0x16d   : > { %1035 = vst [vmem:[%s1649_s22 + $0x18] sm:$0xff] %v1418_v1 }
 0x16e   : > { %v919_v3 = vrot.slane %v918_v32, 1  ;;  %v928_v4 = vrot.slane %v927_v2, 1 }
 0x170   : > { %v920_v5 = vadd.f32 %v919_v3, %v918_v32  ;;  %v929_v6 = vadd.f32 %v928_v4, %v927_v2 }
 0x172   : > { %v935_v7 = vadd.f32 %v933_v42, %v920_v5  ;;  %v936_v8 = vadd.f32 %v933_v42, %v929_v6 }
 0x174   : > { %v1399_v33 = vmul.f32 -1.442695, %v935_v7  ;;  %v1400_v9 = vmul.f32 -1.442695, %v936_v8 }
 0x176   : > { %1484 = vpow2.f32 %v1399_v33 }
 0x177   : > { %1486 = vpow2.f32 %v1400_v9 }
 0x180   : > { %v1485_v10 = vpop.eup %1484 }
 0x181   : > { %v1487_v11 = vpop.eup %1486  ;;  %v943_v12 = vadd.f32 1.0, %v1485_v10 }
 0x182   : > { %v944_v15 = vadd.f32 1.0, %v1487_v11 }
 0x183   : > { %1488 = vrcp.f32 %v943_v12 }
 0x184   : > { %1490 = vrcp.f32 %v944_v15 }
 0x18d   : > { %v1489_v19 = vpop.eup %1488 }
 0x18e   : > { %v1491_v21 = vpop.eup %1490 }
 0x18f   : > { %v951_v22 = vcombine.low %v1489_v19, %v1491_v21 }
 0x191   : > { %v958_v23 = vrot.slane %v951_v22, %v957_v20 }
 0x193   : > { %v965_v24 = vrot.slane %v958_v23, %v957_v20 }
 0x195   : > { %971 = vst.msk [vmem:[%s1657_s26] sm:$0x3] %vm969_vm0, %v965_v24 }
 0x196 PF: > { %s20_s13 = sadd.s32 1, %s1530_s13   ;;  %s1850_s30 = smov %s1522_s11 }
 0x197   : > { %p17_p10 = scmp.ge.s32.totalorder %s20_s13, 8   ;;  %s1851_s10 = smov %s1526_s12 }
 0x198   : > { %s1852_s11 = smov %s1855_s14  ;;  %s1853_s12 = smov %s1859_s15 }
 0x199   :  { %19 = sbr.rel (!%p17_p10) target bundleno = 3 (0x3), region = 133 }

// kernel: frozen_lss_with_hmm_forward.3
= control target key start
LH: loop header
LB: loop body
LE: loop exit
PB: predicated region body
PF: predicated region fallthrough
CT: control target
= control target key end

     0   :  { %8 = vsyncpa [#allocation3], 0  ;;  %s2148_s0 = inlined_call_operand.vmem [shape: bf16[1024,16], index: 0, kind: input, shape index: {}]   ;;  %s2149_s1 = inlined_call_operand.vmem [shape: f32[16,200], index: 1, kind: input, shape index: {}]   ;;  %s2150_s2 = inlined_call_operand.vmem [shape: f32[1,200], index: 2, kind: input, shape index: {}]   ;;  %s2151_s3 = inlined_call_operand.hbm [shape: f32[1024,200], index: 3, kind: output, shape index: {}]  }
   0x1   :  { %10 = vsyncpa [#allocation3 + $0x1], 0  ;;  %s1538_s12 = smov 0   ;;  %s1540_s13 = smov 0  }
   0x2   :  { %s1542_s14 = smov 0   ;;  %s1544_s15 = smov 0  }
   0x3 LB: > { %s1559_s16 = sadd.s32 4294967295, %s1512_s15   ;;  %s1164_s17 = sadd.s32 4294967294, %s1512_s15   ;;  %s1512_s15 = sphi %s1544_s15, %s2157_s15   ;;  %s1508_s14 = sphi %s1542_s14, %s2156_s14   ;;  %s1504_s13 = sphi %s1540_s13, %s2155_s13   ;;  %s1500_s12 = sphi %s1538_s12, %s2154_s12  }
   0x4   : > { %s1563_s18 = sadd.s32 1, %s1512_s15   ;;  %s91_s19 = sadd.s32 1, %s1508_s14 }
   0x5   : > { %s88_s20 = ssub.s32 %s1512_s15, %s1563_s18  ;;  %p101_p0 = scmp.ne.s32.totalorder %s1508_s14, %s1504_s13 }
   0x6   : > { %p89_p1 = scmp.eq.s32.totalorder %s88_s20, 0  ;;  %p102_p2 = scmp.eq.s32.totalorder %s1559_s16, 1 }
   0x7   : > { %p107_p3 = scmp.ne.s32.totalorder %s1504_s13, %s1500_s12  ;;  %p108_p4 = scmp.eq.s32.totalorder %s1164_s17, 1 }
   0x8   : > { %s1574_s21 = scalar_select %p89_p1, %s1508_s14, %s91_s19  }
   0x9   : > { %p1576_p5 = por %p102_p2, %p101_p0  ;;  %p1580_p6 = por %p108_p4, %p107_p3 }
   0xa   : > { %p1167_p7 = scmp.ge.s32.totalorder %s1512_s15, 1  ;;  %p141_p8 = scmp.lt.s32.totalorder %s1512_s15, 3 }
   0xc   : > { %p142_p9 = pnand %p1167_p7, %p141_p8 }
   0xd   : > { %v301_v0 = vld [vmem:[%s2149_s1 + $0x8] sm:$0xff] (!%p142_p9)  ;;  %v303_v1 = vld [vmem:[%s2149_s1 + $0x18] sm:$0xff] (!%p142_p9)  ;;  %v300_v2 = vld [vmem:[%s2149_s1] sm:$0xff] (!%p142_p9)  ;;  %s1169_s30 = sshll.u32 (!%p142_p9), %s1559_s16, 6  ;;  %v1514_v5 = vmov (!%p142_p9), 0.0   ;;  %vm316_vm0 = vcmask (!%p142_p9), 130048  }
   0xe   : > { %145 = sbr.rel (%p142_p9) target bundleno = 382 (0x17e), region = 32  ;;  %v1402_v3 = vpack.c.bf16 (!%p142_p9), %v303_v1, %v301_v0  ;;  %v302_v4 = vld [vmem:[%s2149_s1 + $0x10] sm:$0xff] (!%p142_p9)  ;;  %573 = vmatprep.mubr.f32.mxu0 (!%p142_p9), %v1514_v5  ;;  %765 = vmatprep.mubr.f32.mxu1 (!%p142_p9), %v1514_v5  ;;  %p166_p10 = scmp.lt.s32.totalorder (!%p142_p9), %s1169_s30, 127  ;;  %vm959_vm1 = vcmask (!%p142_p9), 588800  }
   0xf   : > { %v1404_v6 = vpack.c.bf16 (!%p142_p9), %v302_v4, %v300_v2  ;;  %s162_s10 = sand.u32 (!%p142_p9), 1, %s1504_s13   ;;  %s1242_s24 = sshll.u32 (!%p142_p9), %s1559_s16, 14 }
  0x10   : > { %1403 = vmatprep.subr.bf16.mxu0 (!%p142_p9), %v1402_v3  ;;  %1406 = vmatprep.subr.bf16.mxu1 (!%p142_p9), %v1402_v3  ;;  %s1168_s19 = sshll.u32 (!%p142_p9), %s162_s10, 10  ;;  %s2093_s27 = scalar_lea.hbm (!%p142_p9), %s2151_s3, %s1242_s24 }
  0x11   : > { %1405 = vmatpush1.bf16.msra.mxu0 (!%p142_p9), %v1404_v6  ;;  %1407 = vmatpush1.bf16.msra.mxu1 (!%p142_p9), %v1404_v6  ;;  %s1778_s20 = scalar_lea.vmem (!%p142_p9), [#allocation2], %s1168_s19  ;;  %s2107_s28 = scalar_lea.sflag (!%p142_p9), [#allocation3], %s162_s10 }
  0x12   : > { %s1102_s25 = sshll.u32 (!%p142_p9), %s1778_s20, 4  ;;  %s2095_s25 = int_to_ptr.vmem [resolvable:$true] %s1102_s25 }
  0x13   : > { %s1450_s29 = scalar_lea.vmem (!%p142_p9), %s2095_s25, 16384 }
  0x14   : > { %p1451_p11 = scmp.ne.s32.totalorder (!%p142_p9), %s2095_s25, %s1450_s29 }
  0x15   : > { %s2159_s30 = smov (!%p166_p10, %s1169_s30), 127 }
  0x16   : > { %s1170_s6 = sshll.u32 %s2159_s30, 2  ;;  %p1452_p12 = pnand %p1451_p11, %p1576_p5 }
  0x17   : > { %s1604_s9 = scalar_lea.vmem %s2148_s0, %s1170_s6  ;;  %s1515_s30 = smov [#allocation2]  }
  0x18   : > { %v1244_v7 = vld [vmem:[%s1604_s9] sm:$0xff]   ;;  %v1371_v13 = vld [vmem:[%s1604_s9 + $0x8] sm:$0xff]   ;;  %v1372_v19 = vld [vmem:[%s1604_s9 + $0x10] sm:$0xff]   ;;  %p1453_p13 = pneg %p1452_p12  ;;  %s1454_s4 = sshll.u32 %s1515_s30, 4  ;;  %s1455_s4 = int_to_ptr.vmem [resolvable:$false] %s1454_s4 }
  0x19   : > { %v1386_v8 = vld [vmem:[%s1604_s9 + $0x80] sm:$0xff]   ;;  %v1245_v9 = vunpack.c.l.bf16 %v1244_v7  ;;  %v1246_v11 = vunpack.c.h.bf16 %v1244_v7  ;;  %v1387_v14 = vld [vmem:[%s1604_s9 + $0x88] sm:$0xff]   ;;  %v1249_v15 = vunpack.c.l.bf16 %v1371_v13  ;;  %v1250_v17 = vunpack.c.h.bf16 %v1371_v13  ;;  %v1388_v20 = vld [vmem:[%s1604_s9 + $0x90] sm:$0xff]   ;;  %s1456_s5 = scalar_lea.vmem %s1455_s4, 32768  ;;  %p1457_p0 = scmp.lt.s32.totalorder %s2095_s25, %s1455_s4 }
  0x1a   : > { %v1309_v10 = vunpack.c.l.bf16 %v1386_v8  ;;  %v1310_v12 = vunpack.c.h.bf16 %v1386_v8  ;;  %v1313_v16 = vunpack.c.l.bf16 %v1387_v14  ;;  %v1314_v18 = vunpack.c.h.bf16 %v1387_v14  ;;  %v1373_v25 = vld [vmem:[%s1604_s9 + $0x18] sm:$0xff]   ;;  %v1374_v31 = vld [vmem:[%s1604_s9 + $0x20] sm:$0xff]   ;;  %v1375_v37 = vld [vmem:[%s1604_s9 + $0x28] sm:$0xff]   ;;  %p1458_p1 = scmp.lt.s32.totalorder %s1456_s5, %s1450_s29 }
  0x1b   : > { %1171 = vmatmul.mubr.msk.f32.vlgmr.msra.gmra.mrb[0].mxu0 %vm316_vm0, %v1245_v9  ;;  %v1253_v21 = vunpack.c.l.bf16 %v1372_v19  ;;  %v1317_v22 = vunpack.c.l.bf16 %v1388_v20  ;;  %v1254_v23 = vunpack.c.h.bf16 %v1372_v19  ;;  %v1318_v24 = vunpack.c.h.bf16 %v1388_v20  ;;  %v1389_v26 = vld [vmem:[%s1604_s9 + $0x98] sm:$0xff]   ;;  %v1390_v32 = vld [vmem:[%s1604_s9 + $0xa0] sm:$0xff]   ;;  %v1391_v38 = vld [vmem:[%s1604_s9 + $0xa8] sm:$0xff]  }
  0x1c   : > { %1203 = vmatmul.mubr.msk.f32.vlgmr.msra.gmra.mrb[0].mxu1 %vm316_vm0, %v1309_v10  ;;  %579 = vmatprep.mubr.f32.mxu0 %v1514_v5  ;;  %v1257_v27 = vunpack.c.l.bf16 %v1373_v25  ;;  %v1321_v28 = vunpack.c.l.bf16 %v1389_v26  ;;  %v1258_v29 = vunpack.c.h.bf16 %v1373_v25  ;;  %v1322_v30 = vunpack.c.h.bf16 %v1389_v26  ;;  %v1376_v43 = vld [vmem:[%s1604_s9 + $0x30] sm:$0xff]   ;;  %v1377_v49 = vld [vmem:[%s1604_s9 + $0x38] sm:$0xff]   ;;  %v1378_v55 = vld [vmem:[%s1604_s9 + $0x40] sm:$0xff]   ;;  %p1459_p2 = por %p1458_p1, %p1457_p0 }
  0x1d   : > { %771 = vmatprep.mubr.f32.mxu1 %v1514_v5  ;;  %v1261_v33 = vunpack.c.l.bf16 %v1374_v31  ;;  %v1325_v34 = vunpack.c.l.bf16 %v1390_v32  ;;  %v1262_v35 = vunpack.c.h.bf16 %v1374_v31  ;;  %v1326_v36 = vunpack.c.h.bf16 %v1390_v32  ;;  %v1392_v44 = vld [vmem:[%s1604_s9 + $0xb0] sm:$0xff]   ;;  %v1393_v50 = vld [vmem:[%s1604_s9 + $0xb8] sm:$0xff]   ;;  %v1394_v56 = vld [vmem:[%s1604_s9 + $0xc0] sm:$0xff]  }
  0x1e   : > { %v1265_v39 = vunpack.c.l.bf16 %v1375_v37  ;;  %v1329_v40 = vunpack.c.l.bf16 %v1391_v38  ;;  %v1266_v41 = vunpack.c.h.bf16 %v1375_v37  ;;  %v1330_v42 = vunpack.c.h.bf16 %v1391_v38  ;;  %v1379_v61 = vld [vmem:[%s1604_s9 + $0x48] sm:$0xff]   ;;  %v1380_v3 = vld [vmem:[%s1604_s9 + $0x50] sm:$0xff]   ;;  %v1381_v10 = vld [vmem:[%s1604_s9 + $0x58] sm:$0xff]   ;;  %p1460_p3 = pnand %p1459_p2, %p1453_p13 }
  0x1f   : > { %1172 = vmatmul.mubr.msk.f32.gmra.mrb[2].mxu0 %vm316_vm0, %v1246_v11  ;;  %v1269_v45 = vunpack.c.l.bf16 %v1376_v43  ;;  %v1333_v46 = vunpack.c.l.bf16 %v1392_v44  ;;  %v1270_v47 = vunpack.c.h.bf16 %v1376_v43  ;;  %v1334_v48 = vunpack.c.h.bf16 %v1392_v44  ;;  %v1395_v62 = vld [vmem:[%s1604_s9 + $0xc8] sm:$0xff]   ;;  %v1396_v4 = vld [vmem:[%s1604_s9 + $0xd0] sm:$0xff]   ;;  %v1397_v11 = vld [vmem:[%s1604_s9 + $0xd8] sm:$0xff]  }
  0x20   : > { %1204 = vmatmul.mubr.msk.f32.gmra.mrb[2].mxu1 %vm316_vm0, %v1310_v12  ;;  %585 = vmatprep.mubr.f32.mxu0 %v1514_v5  ;;  %v1273_v51 = vunpack.c.l.bf16 %v1377_v49  ;;  %v1337_v52 = vunpack.c.l.bf16 %v1393_v50  ;;  %v1274_v53 = vunpack.c.h.bf16 %v1377_v49  ;;  %v1338_v54 = vunpack.c.h.bf16 %v1393_v50  ;;  %v304_v43 = vld [vmem:[%s2150_s2] sm:$0x3] }
  0x21   : > { %777 = vmatprep.mubr.f32.mxu1 %v1514_v5  ;;  %v1277_v57 = vunpack.c.l.bf16 %v1378_v55  ;;  %v1341_v58 = vunpack.c.l.bf16 %v1394_v56  ;;  %v1278_v59 = vunpack.c.h.bf16 %v1378_v55  ;;  %v1342_v60 = vunpack.c.h.bf16 %v1394_v56 }
  0x22   : > { %v1281_v63 = vunpack.c.l.bf16 %v1379_v61  ;;  %v1345_v0 = vunpack.c.l.bf16 %v1395_v62  ;;  %v1282_v1 = vunpack.c.h.bf16 %v1379_v61  ;;  %v1346_v2 = vunpack.c.h.bf16 %v1395_v62 }
  0x23   : > { %1173 = vmatmul.mubr.msk.f32.gmra.mrb[4].mxu0 %vm316_vm0, %v1249_v15  ;;  %v1285_v6 = vunpack.c.l.bf16 %v1380_v3  ;;  %v1349_v7 = vunpack.c.l.bf16 %v1396_v4  ;;  %v1286_v8 = vunpack.c.h.bf16 %v1380_v3  ;;  %v1350_v9 = vunpack.c.h.bf16 %v1396_v4 }
  0x24   : > { %1205 = vmatmul.mubr.msk.f32.gmra.mrb[4].mxu1 %vm316_vm0, %v1313_v16  ;;  %591 = vmatprep.mubr.f32.mxu0 %v1514_v5  ;;  %v1289_v12 = vunpack.c.l.bf16 %v1381_v10  ;;  %v1353_v13 = vunpack.c.l.bf16 %v1397_v11  ;;  %v1290_v14 = vunpack.c.h.bf16 %v1381_v10  ;;  %v1354_v15 = vunpack.c.h.bf16 %v1397_v11  ;;  %v1382_v16 = vld [vmem:[%s1604_s9 + $0x60] sm:$0xff]  }
  0x25   : > { %783 = vmatprep.mubr.f32.mxu1 %v1514_v5  ;;  %v1294_v20 = vunpack.c.h.bf16 %v1382_v16 }
  0x27   : > { %1174 = vmatmul.mubr.msk.f32.gmra.mrb[6].mxu0 %vm316_vm0, %v1250_v17  ;;  %v1398_v17 = vld [vmem:[%s1604_s9 + $0xe0] sm:$0xff]  }
  0x28   : > { %1206 = vmatmul.mubr.msk.f32.gmra.mrb[6].mxu1 %vm316_vm0, %v1314_v18  ;;  %597 = vmatprep.mubr.f32.mxu0 %v1514_v5  ;;  %v1293_v18 = vunpack.c.l.bf16 %v1382_v16  ;;  %v1357_v19 = vunpack.c.l.bf16 %v1398_v17 }
  0x29   : > { %789 = vmatprep.mubr.f32.mxu1 %v1514_v5 }
  0x2b   : > { %1175 = vmatmul.mubr.msk.f32.gmra.mrb[8].mxu0 %vm316_vm0, %v1253_v21  ;;  %v1358_v21 = vunpack.c.h.bf16 %v1398_v17 }
  0x2c   : > { %1207 = vmatmul.mubr.msk.f32.gmra.mrb[8].mxu1 %vm316_vm0, %v1317_v22  ;;  %603 = vmatprep.mubr.f32.mxu0 %v1514_v5  ;;  %v1383_v22 = vld [vmem:[%s1604_s9 + $0x68] sm:$0xff]  }
  0x2d   : > { %795 = vmatprep.mubr.f32.mxu1 %v1514_v5  ;;  %v1298_v26 = vunpack.c.h.bf16 %v1383_v22 }
  0x2f   : > { %1176 = vmatmul.mubr.msk.f32.gmra.mrb[10].mxu0 %vm316_vm0, %v1254_v23  ;;  %v1399_v23 = vld [vmem:[%s1604_s9 + $0xe8] sm:$0xff]  }
  0x30   : > { %1208 = vmatmul.mubr.msk.f32.gmra.mrb[10].mxu1 %vm316_vm0, %v1318_v24  ;;  %609 = vmatprep.mubr.f32.mxu0 %v1514_v5  ;;  %v1297_v24 = vunpack.c.l.bf16 %v1383_v22  ;;  %v1361_v25 = vunpack.c.l.bf16 %v1399_v23 }
  0x31   : > { %801 = vmatprep.mubr.f32.mxu1 %v1514_v5 }
  0x33   : > { %1177 = vmatmul.mubr.msk.f32.gmra.mrb[12].mxu0 %vm316_vm0, %v1257_v27  ;;  %v1362_v27 = vunpack.c.h.bf16 %v1399_v23 }
  0x34   : > { %1209 = vmatmul.mubr.msk.f32.gmra.mrb[12].mxu1 %vm316_vm0, %v1321_v28  ;;  %615 = vmatprep.mubr.f32.mxu0 %v1514_v5  ;;  %v1384_v28 = vld [vmem:[%s1604_s9 + $0x70] sm:$0xff]  }
  0x35   : > { %807 = vmatprep.mubr.f32.mxu1 %v1514_v5  ;;  %v1302_v32 = vunpack.c.h.bf16 %v1384_v28 }
  0x37   : > { %1178 = vmatmul.mubr.msk.f32.gmra.mrb[14].mxu0 %vm316_vm0, %v1258_v29  ;;  %v1400_v29 = vld [vmem:[%s1604_s9 + $0xf0] sm:$0xff]  }
  0x38   : > { %1210 = vmatmul.mubr.msk.f32.gmra.mrb[14].mxu1 %vm316_vm0, %v1322_v30  ;;  %621 = vmatprep.mubr.f32.mxu0 %v1514_v5  ;;  %v1301_v30 = vunpack.c.l.bf16 %v1384_v28  ;;  %v1365_v31 = vunpack.c.l.bf16 %v1400_v29 }
  0x39   : > { %813 = vmatprep.mubr.f32.mxu1 %v1514_v5 }
  0x3b   : > { %1179 = vmatmul.mubr.msk.f32.gmra.mrb[16].mxu0 %vm316_vm0, %v1261_v33  ;;  %v1366_v33 = vunpack.c.h.bf16 %v1400_v29 }
  0x3c   : > { %1211 = vmatmul.mubr.msk.f32.gmra.mrb[16].mxu1 %vm316_vm0, %v1325_v34  ;;  %627 = vmatprep.mubr.f32.mxu0 %v1514_v5  ;;  %v1385_v34 = vld [vmem:[%s1604_s9 + $0x78] sm:$0xff]  }
  0x3d   : > { %819 = vmatprep.mubr.f32.mxu1 %v1514_v5  ;;  %v1306_v38 = vunpack.c.h.bf16 %v1385_v34 }
  0x3f   : > { %1180 = vmatmul.mubr.msk.f32.gmra.mrb[18].mxu0 %vm316_vm0, %v1262_v35  ;;  %v1401_v35 = vld [vmem:[%s1604_s9 + $0xf8] sm:$0xff]  }
  0x40   : > { %1212 = vmatmul.mubr.msk.f32.gmra.mrb[18].mxu1 %vm316_vm0, %v1326_v36  ;;  %633 = vmatprep.mubr.f32.mxu0 %v1514_v5  ;;  %v1305_v36 = vunpack.c.l.bf16 %v1385_v34  ;;  %v1369_v37 = vunpack.c.l.bf16 %v1401_v35 }
  0x41   : > { %825 = vmatprep.mubr.f32.mxu1 %v1514_v5 }
  0x43   : > { %1181 = vmatmul.mubr.msk.f32.gmra.mrb[20].mxu0 %vm316_vm0, %v1265_v39  ;;  %v1370_v39 = vunpack.c.h.bf16 %v1401_v35 }
  0x44   : > { %1213 = vmatmul.mubr.msk.f32.gmra.mrb[20].mxu1 %vm316_vm0, %v1329_v40  ;;  %639 = vmatprep.mubr.f32.mxu0 %v1514_v5  ;;  %v306_v40 = vlaneseq }
  0x45   : > { %831 = vmatprep.mubr.f32.mxu1 %v1514_v5 }
  0x47   : > { %1182 = vmatmul.mubr.msk.f32.gmra.mrb[22].mxu0 %vm316_vm0, %v1266_v41  ;;  %v307_v41 = vshrl.u32 %v306_v40, 7 }
  0x48   : > { %1214 = vmatmul.mubr.msk.f32.gmra.mrb[22].mxu1 %vm316_vm0, %v1330_v42  ;;  %645 = vmatprep.mubr.f32.mxu0 %v1514_v5 }
  0x49   : > { %837 = vmatprep.mubr.f32.mxu1 %v1514_v5  ;;  %v308_v42 = vsub.s32 0, %v307_v41  ;;  %v312_v44 = vsub.s32 1, %v307_v41 }
  0x4b   : > { %1183 = vmatmul.mubr.msk.f32.gmra.mrb[24].mxu0 %vm316_vm0, %v1269_v45  ;;  %v1770_v45 = vrot.slane %v304_v43, %v308_v42 }
  0x4c   : > { %1215 = vmatmul.mubr.msk.f32.gmra.mrb[24].mxu1 %vm316_vm0, %v1333_v46  ;;  %651 = vmatprep.mubr.f32.mxu0 %v1514_v5  ;;  %v1772_v46 = vrot.slane %v304_v43, %v312_v44 }
  0x4d   : > { %843 = vmatprep.mubr.f32.mxu1 %v1514_v5 }
  0x4f   : > { %1184 = vmatmul.mubr.msk.f32.gmra.mrb[26].mxu0 %vm316_vm0, %v1270_v47 }
  0x50   : > { %1216 = vmatmul.mubr.msk.f32.gmra.mrb[26].mxu1 %vm316_vm0, %v1334_v48  ;;  %657 = vmatprep.mubr.f32.mxu0 %v1514_v5 }
  0x51   : > { %849 = vmatprep.mubr.f32.mxu1 %v1514_v5 }
  0x53   : > { %1185 = vmatmul.mubr.msk.f32.gmra.mrb[28].mxu0 %vm316_vm0, %v1273_v51 }
  0x54   : > { %1217 = vmatmul.mubr.msk.f32.gmra.mrb[28].mxu1 %vm316_vm0, %v1337_v52  ;;  %663 = vmatprep.mubr.f32.mxu0 %v1514_v5 }
  0x55   : > { %855 = vmatprep.mubr.f32.mxu1 %v1514_v5 }
  0x57   : > { %1186 = vmatmul.mubr.msk.f32.gmra.mrb[30].mxu0 %vm316_vm0, %v1274_v53 }
  0x58   : > { %1218 = vmatmul.mubr.msk.f32.gmra.mrb[30].mxu1 %vm316_vm0, %v1338_v54  ;;  %669 = vmatprep.mubr.f32.mxu0 %v1514_v5 }
  0x59   : > { %861 = vmatprep.mubr.f32.mxu1 %v1514_v5 }
  0x5b   : > { %1187 = vmatmul.mubr.msk.f32.gmra.mrb[32].mxu0 %vm316_vm0, %v1277_v57 }
  0x5c   : > { %1219 = vmatmul.mubr.msk.f32.gmra.mrb[32].mxu1 %vm316_vm0, %v1341_v58  ;;  %675 = vmatprep.mubr.f32.mxu0 %v1514_v5 }
  0x5d   : > { %867 = vmatprep.mubr.f32.mxu1 %v1514_v5 }
  0x5f   : > { %1188 = vmatmul.mubr.msk.f32.gmra.mrb[34].mxu0 %vm316_vm0, %v1278_v59 }
  0x60   : > { %1220 = vmatmul.mubr.msk.f32.gmra.mrb[34].mxu1 %vm316_vm0, %v1342_v60  ;;  %681 = vmatprep.mubr.f32.mxu0 %v1514_v5 }
  0x61   : > { %873 = vmatprep.mubr.f32.mxu1 %v1514_v5 }
  0x63   : > { %1189 = vmatmul.mubr.msk.f32.gmra.mrb[36].mxu0 %vm316_vm0, %v1281_v63 }
  0x64   : > { %1221 = vmatmul.mubr.msk.f32.gmra.mrb[36].mxu1 %vm316_vm0, %v1345_v0  ;;  %687 = vmatprep.mubr.f32.mxu0 %v1514_v5 }
  0x65   : > { %879 = vmatprep.mubr.f32.mxu1 %v1514_v5 }
  0x67   : > { %1190 = vmatmul.mubr.msk.f32.gmra.mrb[38].mxu0 %vm316_vm0, %v1282_v1 }
  0x68   : > { %1222 = vmatmul.mubr.msk.f32.gmra.mrb[38].mxu1 %vm316_vm0, %v1346_v2  ;;  %693 = vmatprep.mubr.f32.mxu0 %v1514_v5 }
  0x69   : > { %885 = vmatprep.mubr.f32.mxu1 %v1514_v5 }
  0x6b   : > { %1191 = vmatmul.mubr.msk.f32.gmra.mrb[40].mxu0 %vm316_vm0, %v1285_v6 }
  0x6c   : > { %1223 = vmatmul.mubr.msk.f32.gmra.mrb[40].mxu1 %vm316_vm0, %v1349_v7  ;;  %699 = vmatprep.mubr.f32.mxu0 %v1514_v5 }
  0x6d   : > { %891 = vmatprep.mubr.f32.mxu1 %v1514_v5 }
  0x6f   : > { %1192 = vmatmul.mubr.msk.f32.gmra.mrb[42].mxu0 %vm316_vm0, %v1286_v8 }
  0x70   : > { %1224 = vmatmul.mubr.msk.f32.gmra.mrb[42].mxu1 %vm316_vm0, %v1350_v9  ;;  %705 = vmatprep.mubr.f32.mxu0 %v1514_v5 }
  0x71   : > { %897 = vmatprep.mubr.f32.mxu1 %v1514_v5 }
  0x73   : > { %1193 = vmatmul.mubr.msk.f32.gmra.mrb[44].mxu0 %vm316_vm0, %v1289_v12 }
  0x74   : > { %1225 = vmatmul.mubr.msk.f32.gmra.mrb[44].mxu1 %vm316_vm0, %v1353_v13  ;;  %711 = vmatprep.mubr.f32.mxu0 %v1514_v5 }
  0x75   : > { %903 = vmatprep.mubr.f32.mxu1 %v1514_v5 }
  0x77   : > { %1194 = vmatmul.mubr.msk.f32.gmra.mrb[46].mxu0 %vm316_vm0, %v1290_v14 }
  0x78   : > { %1226 = vmatmul.mubr.msk.f32.gmra.mrb[46].mxu1 %vm316_vm0, %v1354_v15  ;;  %717 = vmatprep.mubr.f32.mxu0 %v1514_v5 }
  0x79   : > { %909 = vmatprep.mubr.f32.mxu1 %v1514_v5 }
  0x7b   : > { %1195 = vmatmul.mubr.msk.f32.gmra.mrb[48].mxu0 %vm316_vm0, %v1293_v18 }
  0x7c   : > { %1227 = vmatmul.mubr.msk.f32.gmra.mrb[48].mxu1 %vm316_vm0, %v1357_v19  ;;  %723 = vmatprep.mubr.f32.mxu0 %v1514_v5 }
  0x7d   : > { %915 = vmatprep.mubr.f32.mxu1 %v1514_v5 }
  0x7f   : > { %1196 = vmatmul.mubr.msk.f32.gmra.mrb[50].mxu0 %vm316_vm0, %v1294_v20 }
  0x80   : > { %1228 = vmatmul.mubr.msk.f32.gmra.mrb[50].mxu1 %vm316_vm0, %v1358_v21  ;;  %729 = vmatprep.mubr.f32.mxu0 %v1514_v5 }
  0x81   : > { %921 = vmatprep.mubr.f32.mxu1 %v1514_v5 }
  0x83   : > { %1197 = vmatmul.mubr.msk.f32.gmra.mrb[52].mxu0 %vm316_vm0, %v1297_v24 }
  0x84   : > { %1229 = vmatmul.mubr.msk.f32.gmra.mrb[52].mxu1 %vm316_vm0, %v1361_v25  ;;  %735 = vmatprep.mubr.f32.mxu0 %v1514_v5 }
  0x85   : > { %927 = vmatprep.mubr.f32.mxu1 %v1514_v5 }
  0x87   : > { %1198 = vmatmul.mubr.msk.f32.gmra.mrb[54].mxu0 %vm316_vm0, %v1298_v26 }
  0x88   : > { %1230 = vmatmul.mubr.msk.f32.gmra.mrb[54].mxu1 %vm316_vm0, %v1362_v27  ;;  %741 = vmatprep.mubr.f32.mxu0 %v1514_v5 }
  0x89   : > { %933 = vmatprep.mubr.f32.mxu1 %v1514_v5 }
  0x8b   : > { %1199 = vmatmul.mubr.msk.f32.gmra.mrb[56].mxu0 %vm316_vm0, %v1301_v30 }
  0x8c   : > { %1231 = vmatmul.mubr.msk.f32.gmra.mrb[56].mxu1 %vm316_vm0, %v1365_v31  ;;  %747 = vmatprep.mubr.f32.mxu0 %v1514_v5 }
  0x8d   : > { %939 = vmatprep.mubr.f32.mxu1 %v1514_v5 }
  0x8f   : > { %1200 = vmatmul.mubr.msk.f32.gmra.mrb[58].mxu0 %vm316_vm0, %v1302_v32 }
  0x90   : > { %1232 = vmatmul.mubr.msk.f32.gmra.mrb[58].mxu1 %vm316_vm0, %v1366_v33  ;;  %753 = vmatprep.mubr.f32.mxu0 %v1514_v5 }
  0x91   : > { %945 = vmatprep.mubr.f32.mxu1 %v1514_v5 }
  0x93   : > { %1201 = vmatmul.mubr.msk.f32.gmra.mrb[60].mxu0 %vm316_vm0, %v1305_v36 }
  0x94   : > { %1233 = vmatmul.mubr.msk.f32.gmra.mrb[60].mxu1 %vm316_vm0, %v1369_v37  ;;  %759 = vmatprep.mubr.f32.mxu0 %v1514_v5 }
  0x95   : > { %951 = vmatprep.mubr.f32.mxu1 %v1514_v5 }
  0x97   : > { %1202 = vmatmul.mubr.msk.f32.gmra.mrb[62].mxu0 %vm316_vm0, %v1306_v38 }
  0x98   : > { %1234 = vmatmul.mubr.msk.f32.gmra.mrb[62].mxu1 %vm316_vm0, %v1370_v39 }
  0xee   : > { %v575_v5 = vpop.f32.mrb[0].mxu0 }
  0xef   : > { %v767_v47 = vpop.f32.mrb[0].mxu1  ;;  %v576_v48 = vadd.f32 %v575_v5, %v1770_v45  ;;  %v577_v50 = vpop.f32.mrb[1].mxu0 }
  0xf0   : > { %v768_v49 = vadd.f32 %v767_v47, %v1770_v45  ;;  %v769_v51 = vpop.f32.mrb[1].mxu1  ;;  %v578_v52 = vadd.f32 %v577_v50, %v1772_v46 }
  0xf1   : > { %v770_v53 = vadd.f32 %v769_v51, %v1772_v46  ;;  %958 = vst [vmem:[%s1778_s20] sm:$0xff] %v576_v48 }
  0xf2   : > { %1023 = vst [vmem:[%s1778_s20 + $0x200] sm:$0xff] %v768_v49  ;;  %960 = vst.msk [vmem:[%s1778_s20 + $0x8] sm:$0xff] %vm959_vm1, %v578_v52  ;;  %v581_v54 = vpop.f32.mrb[2].mxu0 }
  0xf3   : > { %1024 = vst.msk [vmem:[%s1778_s20 + $0x208] sm:$0xff] %vm959_vm1, %v770_v53  ;;  %v773_v55 = vpop.f32.mrb[2].mxu1  ;;  %v582_v56 = vadd.f32 %v581_v54, %v1770_v45  ;;  %v583_v58 = vpop.f32.mrb[3].mxu0 }
  0xf4   : > { %v774_v57 = vadd.f32 %v773_v55, %v1770_v45  ;;  %v775_v59 = vpop.f32.mrb[3].mxu1  ;;  %v584_v60 = vadd.f32 %v583_v58, %v1772_v46 }
  0xf5   : > { %v776_v61 = vadd.f32 %v775_v59, %v1772_v46  ;;  %961 = vst [vmem:[%s1778_s20 + $0x10] sm:$0xff] %v582_v56 }
  0xf6   : > { %1025 = vst [vmem:[%s1778_s20 + $0x210] sm:$0xff] %v774_v57  ;;  %962 = vst.msk [vmem:[%s1778_s20 + $0x18] sm:$0xff] %vm959_vm1, %v584_v60  ;;  %v587_v62 = vpop.f32.mrb[4].mxu0 }
  0xf7   : > { %1026 = vst.msk [vmem:[%s1778_s20 + $0x218] sm:$0xff] %vm959_vm1, %v776_v61  ;;  %v779_v63 = vpop.f32.mrb[4].mxu1  ;;  %v588_v0 = vadd.f32 %v587_v62, %v1770_v45  ;;  %v589_v2 = vpop.f32.mrb[5].mxu0 }
  0xf8   : > { %v780_v1 = vadd.f32 %v779_v63, %v1770_v45  ;;  %v781_v3 = vpop.f32.mrb[5].mxu1  ;;  %v590_v4 = vadd.f32 %v589_v2, %v1772_v46 }
  0xf9   : > { %v782_v6 = vadd.f32 %v781_v3, %v1772_v46  ;;  %963 = vst [vmem:[%s1778_s20 + $0x20] sm:$0xff] %v588_v0 }
  0xfa   : > { %1027 = vst [vmem:[%s1778_s20 + $0x220] sm:$0xff] %v780_v1  ;;  %964 = vst.msk [vmem:[%s1778_s20 + $0x28] sm:$0xff] %vm959_vm1, %v590_v4  ;;  %v593_v7 = vpop.f32.mrb[6].mxu0 }
  0xfb   : > { %1028 = vst.msk [vmem:[%s1778_s20 + $0x228] sm:$0xff] %vm959_vm1, %v782_v6  ;;  %v785_v8 = vpop.f32.mrb[6].mxu1  ;;  %v594_v9 = vadd.f32 %v593_v7, %v1770_v45  ;;  %v595_v11 = vpop.f32.mrb[7].mxu0 }
  0xfc   : > { %v786_v10 = vadd.f32 %v785_v8, %v1770_v45  ;;  %v787_v12 = vpop.f32.mrb[7].mxu1  ;;  %v596_v13 = vadd.f32 %v595_v11, %v1772_v46 }
  0xfd   : > { %v788_v14 = vadd.f32 %v787_v12, %v1772_v46  ;;  %965 = vst [vmem:[%s1778_s20 + $0x30] sm:$0xff] %v594_v9 }
  0xfe   : > { %1029 = vst [vmem:[%s1778_s20 + $0x230] sm:$0xff] %v786_v10  ;;  %966 = vst.msk [vmem:[%s1778_s20 + $0x38] sm:$0xff] %vm959_vm1, %v596_v13  ;;  %v599_v15 = vpop.f32.mrb[8].mxu0 }
  0xff   : > { %1030 = vst.msk [vmem:[%s1778_s20 + $0x238] sm:$0xff] %vm959_vm1, %v788_v14  ;;  %v791_v16 = vpop.f32.mrb[8].mxu1  ;;  %v600_v17 = vadd.f32 %v599_v15, %v1770_v45  ;;  %v601_v19 = vpop.f32.mrb[9].mxu0 }
 0x100   : > { %v792_v18 = vadd.f32 %v791_v16, %v1770_v45  ;;  %v793_v20 = vpop.f32.mrb[9].mxu1  ;;  %v602_v21 = vadd.f32 %v601_v19, %v1772_v46 }
 0x101   : > { %v794_v22 = vadd.f32 %v793_v20, %v1772_v46  ;;  %967 = vst [vmem:[%s1778_s20 + $0x40] sm:$0xff] %v600_v17 }
 0x102   : > { %1031 = vst [vmem:[%s1778_s20 + $0x240] sm:$0xff] %v792_v18  ;;  %968 = vst.msk [vmem:[%s1778_s20 + $0x48] sm:$0xff] %vm959_vm1, %v602_v21  ;;  %v605_v23 = vpop.f32.mrb[10].mxu0 }
 0x103   : > { %1032 = vst.msk [vmem:[%s1778_s20 + $0x248] sm:$0xff] %vm959_vm1, %v794_v22  ;;  %v797_v24 = vpop.f32.mrb[10].mxu1  ;;  %v606_v25 = vadd.f32 %v605_v23, %v1770_v45  ;;  %v607_v27 = vpop.f32.mrb[11].mxu0 }
 0x104   : > { %v798_v26 = vadd.f32 %v797_v24, %v1770_v45  ;;  %v799_v28 = vpop.f32.mrb[11].mxu1  ;;  %v608_v29 = vadd.f32 %v607_v27, %v1772_v46 }
 0x105   : > { %v800_v30 = vadd.f32 %v799_v28, %v1772_v46  ;;  %969 = vst [vmem:[%s1778_s20 + $0x50] sm:$0xff] %v606_v25 }
 0x106   : > { %1033 = vst [vmem:[%s1778_s20 + $0x250] sm:$0xff] %v798_v26  ;;  %970 = vst.msk [vmem:[%s1778_s20 + $0x58] sm:$0xff] %vm959_vm1, %v608_v29  ;;  %v611_v31 = vpop.f32.mrb[12].mxu0 }
 0x107   : > { %1034 = vst.msk [vmem:[%s1778_s20 + $0x258] sm:$0xff] %vm959_vm1, %v800_v30  ;;  %v803_v32 = vpop.f32.mrb[12].mxu1  ;;  %v612_v33 = vadd.f32 %v611_v31, %v1770_v45  ;;  %v613_v35 = vpop.f32.mrb[13].mxu0 }
 0x108   : > { %v804_v34 = vadd.f32 %v803_v32, %v1770_v45  ;;  %v805_v36 = vpop.f32.mrb[13].mxu1  ;;  %v614_v37 = vadd.f32 %v613_v35, %v1772_v46 }
 0x109   : > { %v806_v38 = vadd.f32 %v805_v36, %v1772_v46  ;;  %971 = vst [vmem:[%s1778_s20 + $0x60] sm:$0xff] %v612_v33 }
 0x10a   : > { %1035 = vst [vmem:[%s1778_s20 + $0x260] sm:$0xff] %v804_v34  ;;  %972 = vst.msk [vmem:[%s1778_s20 + $0x68] sm:$0xff] %vm959_vm1, %v614_v37  ;;  %v617_v39 = vpop.f32.mrb[14].mxu0 }
 0x10b   : > { %1036 = vst.msk [vmem:[%s1778_s20 + $0x268] sm:$0xff] %vm959_vm1, %v806_v38  ;;  %v809_v40 = vpop.f32.mrb[14].mxu1  ;;  %v618_v41 = vadd.f32 %v617_v39, %v1770_v45  ;;  %v619_v43 = vpop.f32.mrb[15].mxu0 }
 0x10c   : > { %v810_v42 = vadd.f32 %v809_v40, %v1770_v45  ;;  %v811_v44 = vpop.f32.mrb[15].mxu1  ;;  %v620_v5 = vadd.f32 %v619_v43, %v1772_v46 }
 0x10d   : > { %v812_v47 = vadd.f32 %v811_v44, %v1772_v46  ;;  %973 = vst [vmem:[%s1778_s20 + $0x70] sm:$0xff] %v618_v41 }
 0x10e   : > { %1037 = vst [vmem:[%s1778_s20 + $0x270] sm:$0xff] %v810_v42  ;;  %974 = vst.msk [vmem:[%s1778_s20 + $0x78] sm:$0xff] %vm959_vm1, %v620_v5  ;;  %v623_v48 = vpop.f32.mrb[16].mxu0 }
 0x10f   : > { %1038 = vst.msk [vmem:[%s1778_s20 + $0x278] sm:$0xff] %vm959_vm1, %v812_v47  ;;  %v815_v49 = vpop.f32.mrb[16].mxu1  ;;  %v624_v50 = vadd.f32 %v623_v48, %v1770_v45  ;;  %v625_v52 = vpop.f32.mrb[17].mxu0 }
 0x110   : > { %v816_v51 = vadd.f32 %v815_v49, %v1770_v45  ;;  %v817_v53 = vpop.f32.mrb[17].mxu1  ;;  %v626_v54 = vadd.f32 %v625_v52, %v1772_v46 }
 0x111   : > { %v818_v55 = vadd.f32 %v817_v53, %v1772_v46  ;;  %975 = vst [vmem:[%s1778_s20 + $0x80] sm:$0xff] %v624_v50 }
 0x112   : > { %1039 = vst [vmem:[%s1778_s20 + $0x280] sm:$0xff] %v816_v51  ;;  %976 = vst.msk [vmem:[%s1778_s20 + $0x88] sm:$0xff] %vm959_vm1, %v626_v54  ;;  %v629_v56 = vpop.f32.mrb[18].mxu0 }
 0x113   : > { %1040 = vst.msk [vmem:[%s1778_s20 + $0x288] sm:$0xff] %vm959_vm1, %v818_v55  ;;  %v821_v57 = vpop.f32.mrb[18].mxu1  ;;  %v630_v58 = vadd.f32 %v629_v56, %v1770_v45  ;;  %v631_v60 = vpop.f32.mrb[19].mxu0 }
 0x114   : > { %v822_v59 = vadd.f32 %v821_v57, %v1770_v45  ;;  %v823_v61 = vpop.f32.mrb[19].mxu1  ;;  %v632_v62 = vadd.f32 %v631_v60, %v1772_v46 }
 0x115   : > { %v824_v63 = vadd.f32 %v823_v61, %v1772_v46  ;;  %977 = vst [vmem:[%s1778_s20 + $0x90] sm:$0xff] %v630_v58 }
 0x116   : > { %1041 = vst [vmem:[%s1778_s20 + $0x290] sm:$0xff] %v822_v59  ;;  %978 = vst.msk [vmem:[%s1778_s20 + $0x98] sm:$0xff] %vm959_vm1, %v632_v62  ;;  %v635_v0 = vpop.f32.mrb[20].mxu0 }
 0x117   : > { %1042 = vst.msk [vmem:[%s1778_s20 + $0x298] sm:$0xff] %vm959_vm1, %v824_v63  ;;  %v827_v1 = vpop.f32.mrb[20].mxu1  ;;  %v636_v2 = vadd.f32 %v635_v0, %v1770_v45  ;;  %v637_v4 = vpop.f32.mrb[21].mxu0 }
 0x118   : > { %v828_v3 = vadd.f32 %v827_v1, %v1770_v45  ;;  %v829_v6 = vpop.f32.mrb[21].mxu1  ;;  %v638_v7 = vadd.f32 %v637_v4, %v1772_v46 }
 0x119   : > { %v830_v8 = vadd.f32 %v829_v6, %v1772_v46  ;;  %979 = vst [vmem:[%s1778_s20 + $0xa0] sm:$0xff] %v636_v2 }
 0x11a   : > { %1043 = vst [vmem:[%s1778_s20 + $0x2a0] sm:$0xff] %v828_v3  ;;  %980 = vst.msk [vmem:[%s1778_s20 + $0xa8] sm:$0xff] %vm959_vm1, %v638_v7  ;;  %v641_v9 = vpop.f32.mrb[22].mxu0 }
 0x11b   : > { %1044 = vst.msk [vmem:[%s1778_s20 + $0x2a8] sm:$0xff] %vm959_vm1, %v830_v8  ;;  %v833_v10 = vpop.f32.mrb[22].mxu1  ;;  %v642_v11 = vadd.f32 %v641_v9, %v1770_v45  ;;  %v643_v13 = vpop.f32.mrb[23].mxu0 }
 0x11c   : > { %v834_v12 = vadd.f32 %v833_v10, %v1770_v45  ;;  %v835_v14 = vpop.f32.mrb[23].mxu1  ;;  %v644_v15 = vadd.f32 %v643_v13, %v1772_v46 }
 0x11d   : > { %v836_v16 = vadd.f32 %v835_v14, %v1772_v46  ;;  %981 = vst [vmem:[%s1778_s20 + $0xb0] sm:$0xff] %v642_v11 }
 0x11e   : > { %1045 = vst [vmem:[%s1778_s20 + $0x2b0] sm:$0xff] %v834_v12  ;;  %982 = vst.msk [vmem:[%s1778_s20 + $0xb8] sm:$0xff] %vm959_vm1, %v644_v15  ;;  %v647_v17 = vpop.f32.mrb[24].mxu0 }
 0x11f   : > { %1046 = vst.msk [vmem:[%s1778_s20 + $0x2b8] sm:$0xff] %vm959_vm1, %v836_v16  ;;  %v839_v18 = vpop.f32.mrb[24].mxu1  ;;  %v648_v19 = vadd.f32 %v647_v17, %v1770_v45  ;;  %v649_v21 = vpop.f32.mrb[25].mxu0 }
 0x120   : > { %v840_v20 = vadd.f32 %v839_v18, %v1770_v45  ;;  %v841_v22 = vpop.f32.mrb[25].mxu1  ;;  %v650_v23 = vadd.f32 %v649_v21, %v1772_v46 }
 0x121   : > { %v842_v24 = vadd.f32 %v841_v22, %v1772_v46  ;;  %983 = vst [vmem:[%s1778_s20 + $0xc0] sm:$0xff] %v648_v19 }
 0x122   : > { %1047 = vst [vmem:[%s1778_s20 + $0x2c0] sm:$0xff] %v840_v20  ;;  %984 = vst.msk [vmem:[%s1778_s20 + $0xc8] sm:$0xff] %vm959_vm1, %v650_v23  ;;  %v653_v25 = vpop.f32.mrb[26].mxu0 }
 0x123   : > { %1048 = vst.msk [vmem:[%s1778_s20 + $0x2c8] sm:$0xff] %vm959_vm1, %v842_v24  ;;  %v845_v26 = vpop.f32.mrb[26].mxu1  ;;  %v654_v27 = vadd.f32 %v653_v25, %v1770_v45  ;;  %v655_v29 = vpop.f32.mrb[27].mxu0 }
 0x124   : > { %v846_v28 = vadd.f32 %v845_v26, %v1770_v45  ;;  %v847_v30 = vpop.f32.mrb[27].mxu1  ;;  %v656_v31 = vadd.f32 %v655_v29, %v1772_v46 }
 0x125   : > { %v848_v32 = vadd.f32 %v847_v30, %v1772_v46  ;;  %985 = vst [vmem:[%s1778_s20 + $0xd0] sm:$0xff] %v654_v27 }
 0x126   : > { %1049 = vst [vmem:[%s1778_s20 + $0x2d0] sm:$0xff] %v846_v28  ;;  %986 = vst.msk [vmem:[%s1778_s20 + $0xd8] sm:$0xff] %vm959_vm1, %v656_v31  ;;  %v659_v33 = vpop.f32.mrb[28].mxu0 }
 0x127   : > { %1050 = vst.msk [vmem:[%s1778_s20 + $0x2d8] sm:$0xff] %vm959_vm1, %v848_v32  ;;  %v851_v34 = vpop.f32.mrb[28].mxu1  ;;  %v660_v35 = vadd.f32 %v659_v33, %v1770_v45  ;;  %v661_v37 = vpop.f32.mrb[29].mxu0 }
 0x128   : > { %v852_v36 = vadd.f32 %v851_v34, %v1770_v45  ;;  %v853_v38 = vpop.f32.mrb[29].mxu1  ;;  %v662_v39 = vadd.f32 %v661_v37, %v1772_v46 }
 0x129   : > { %v854_v40 = vadd.f32 %v853_v38, %v1772_v46  ;;  %987 = vst [vmem:[%s1778_s20 + $0xe0] sm:$0xff] %v660_v35 }
 0x12a   : > { %1051 = vst [vmem:[%s1778_s20 + $0x2e0] sm:$0xff] %v852_v36  ;;  %988 = vst.msk [vmem:[%s1778_s20 + $0xe8] sm:$0xff] %vm959_vm1, %v662_v39  ;;  %v665_v41 = vpop.f32.mrb[30].mxu0 }
 0x12b   : > { %1052 = vst.msk [vmem:[%s1778_s20 + $0x2e8] sm:$0xff] %vm959_vm1, %v854_v40  ;;  %v857_v42 = vpop.f32.mrb[30].mxu1  ;;  %v666_v43 = vadd.f32 %v665_v41, %v1770_v45  ;;  %v667_v5 = vpop.f32.mrb[31].mxu0 }
 0x12c   : > { %v858_v44 = vadd.f32 %v857_v42, %v1770_v45  ;;  %v859_v47 = vpop.f32.mrb[31].mxu1  ;;  %v668_v48 = vadd.f32 %v667_v5, %v1772_v46 }
 0x12d   : > { %v860_v49 = vadd.f32 %v859_v47, %v1772_v46  ;;  %989 = vst [vmem:[%s1778_s20 + $0xf0] sm:$0xff] %v666_v43 }
 0x12e   : > { %1053 = vst [vmem:[%s1778_s20 + $0x2f0] sm:$0xff] %v858_v44  ;;  %990 = vst.msk [vmem:[%s1778_s20 + $0xf8] sm:$0xff] %vm959_vm1, %v668_v48  ;;  %v671_v50 = vpop.f32.mrb[32].mxu0 }
 0x12f   : > { %1054 = vst.msk [vmem:[%s1778_s20 + $0x2f8] sm:$0xff] %vm959_vm1, %v860_v49  ;;  %v863_v51 = vpop.f32.mrb[32].mxu1  ;;  %v672_v52 = vadd.f32 %v671_v50, %v1770_v45  ;;  %v673_v54 = vpop.f32.mrb[33].mxu0 }
 0x130   : > { %v864_v53 = vadd.f32 %v863_v51, %v1770_v45  ;;  %v865_v55 = vpop.f32.mrb[33].mxu1  ;;  %v674_v56 = vadd.f32 %v673_v54, %v1772_v46 }
 0x131   : > { %v866_v57 = vadd.f32 %v865_v55, %v1772_v46  ;;  %991 = vst [vmem:[%s1778_s20 + $0x100] sm:$0xff] %v672_v52 }
 0x132   : > { %1055 = vst [vmem:[%s1778_s20 + $0x300] sm:$0xff] %v864_v53  ;;  %992 = vst.msk [vmem:[%s1778_s20 + $0x108] sm:$0xff] %vm959_vm1, %v674_v56  ;;  %v677_v58 = vpop.f32.mrb[34].mxu0 }
 0x133   : > { %1056 = vst.msk [vmem:[%s1778_s20 + $0x308] sm:$0xff] %vm959_vm1, %v866_v57  ;;  %v869_v59 = vpop.f32.mrb[34].mxu1  ;;  %v678_v60 = vadd.f32 %v677_v58, %v1770_v45  ;;  %v679_v62 = vpop.f32.mrb[35].mxu0 }
 0x134   : > { %v870_v61 = vadd.f32 %v869_v59, %v1770_v45  ;;  %v871_v63 = vpop.f32.mrb[35].mxu1  ;;  %v680_v0 = vadd.f32 %v679_v62, %v1772_v46 }
 0x135   : > { %v872_v1 = vadd.f32 %v871_v63, %v1772_v46  ;;  %993 = vst [vmem:[%s1778_s20 + $0x110] sm:$0xff] %v678_v60 }
 0x136   : > { %1057 = vst [vmem:[%s1778_s20 + $0x310] sm:$0xff] %v870_v61  ;;  %994 = vst.msk [vmem:[%s1778_s20 + $0x118] sm:$0xff] %vm959_vm1, %v680_v0  ;;  %v683_v2 = vpop.f32.mrb[36].mxu0 }
 0x137   : > { %1058 = vst.msk [vmem:[%s1778_s20 + $0x318] sm:$0xff] %vm959_vm1, %v872_v1  ;;  %v875_v3 = vpop.f32.mrb[36].mxu1  ;;  %v684_v4 = vadd.f32 %v683_v2, %v1770_v45  ;;  %v685_v7 = vpop.f32.mrb[37].mxu0 }
 0x138   : > { %v876_v6 = vadd.f32 %v875_v3, %v1770_v45  ;;  %v877_v8 = vpop.f32.mrb[37].mxu1  ;;  %v686_v9 = vadd.f32 %v685_v7, %v1772_v46 }
 0x139   : > { %v878_v10 = vadd.f32 %v877_v8, %v1772_v46  ;;  %995 = vst [vmem:[%s1778_s20 + $0x120] sm:$0xff] %v684_v4 }
 0x13a   : > { %1059 = vst [vmem:[%s1778_s20 + $0x320] sm:$0xff] %v876_v6  ;;  %996 = vst.msk [vmem:[%s1778_s20 + $0x128] sm:$0xff] %vm959_vm1, %v686_v9  ;;  %v689_v11 = vpop.f32.mrb[38].mxu0 }
 0x13b   : > { %1060 = vst.msk [vmem:[%s1778_s20 + $0x328] sm:$0xff] %vm959_vm1, %v878_v10  ;;  %v881_v12 = vpop.f32.mrb[38].mxu1  ;;  %v690_v13 = vadd.f32 %v689_v11, %v1770_v45  ;;  %v691_v15 = vpop.f32.mrb[39].mxu0 }
 0x13c   : > { %v882_v14 = vadd.f32 %v881_v12, %v1770_v45  ;;  %v883_v16 = vpop.f32.mrb[39].mxu1  ;;  %v692_v17 = vadd.f32 %v691_v15, %v1772_v46 }
 0x13d   : > { %v884_v18 = vadd.f32 %v883_v16, %v1772_v46  ;;  %997 = vst [vmem:[%s1778_s20 + $0x130] sm:$0xff] %v690_v13 }
 0x13e   : > { %1061 = vst [vmem:[%s1778_s20 + $0x330] sm:$0xff] %v882_v14  ;;  %998 = vst.msk [vmem:[%s1778_s20 + $0x138] sm:$0xff] %vm959_vm1, %v692_v17  ;;  %v695_v19 = vpop.f32.mrb[40].mxu0 }
 0x13f   : > { %1062 = vst.msk [vmem:[%s1778_s20 + $0x338] sm:$0xff] %vm959_vm1, %v884_v18  ;;  %v887_v20 = vpop.f32.mrb[40].mxu1  ;;  %v696_v21 = vadd.f32 %v695_v19, %v1770_v45  ;;  %v697_v23 = vpop.f32.mrb[41].mxu0 }
 0x140   : > { %v888_v22 = vadd.f32 %v887_v20, %v1770_v45  ;;  %v889_v24 = vpop.f32.mrb[41].mxu1  ;;  %v698_v25 = vadd.f32 %v697_v23, %v1772_v46 }
 0x141   : > { %v890_v26 = vadd.f32 %v889_v24, %v1772_v46  ;;  %999 = vst [vmem:[%s1778_s20 + $0x140] sm:$0xff] %v696_v21 }
 0x142   : > { %1063 = vst [vmem:[%s1778_s20 + $0x340] sm:$0xff] %v888_v22  ;;  %1000 = vst.msk [vmem:[%s1778_s20 + $0x148] sm:$0xff] %vm959_vm1, %v698_v25  ;;  %v701_v27 = vpop.f32.mrb[42].mxu0 }
 0x143   : > { %1064 = vst.msk [vmem:[%s1778_s20 + $0x348] sm:$0xff] %vm959_vm1, %v890_v26  ;;  %v893_v28 = vpop.f32.mrb[42].mxu1  ;;  %v702_v29 = vadd.f32 %v701_v27, %v1770_v45  ;;  %v703_v31 = vpop.f32.mrb[43].mxu0 }
 0x144   : > { %v894_v30 = vadd.f32 %v893_v28, %v1770_v45  ;;  %v895_v32 = vpop.f32.mrb[43].mxu1  ;;  %v704_v33 = vadd.f32 %v703_v31, %v1772_v46 }
 0x145   : > { %v896_v34 = vadd.f32 %v895_v32, %v1772_v46  ;;  %1001 = vst [vmem:[%s1778_s20 + $0x150] sm:$0xff] %v702_v29 }
 0x146   : > { %1065 = vst [vmem:[%s1778_s20 + $0x350] sm:$0xff] %v894_v30  ;;  %1002 = vst.msk [vmem:[%s1778_s20 + $0x158] sm:$0xff] %vm959_vm1, %v704_v33  ;;  %v707_v35 = vpop.f32.mrb[44].mxu0 }
 0x147   : > { %1066 = vst.msk [vmem:[%s1778_s20 + $0x358] sm:$0xff] %vm959_vm1, %v896_v34  ;;  %v899_v36 = vpop.f32.mrb[44].mxu1  ;;  %v708_v37 = vadd.f32 %v707_v35, %v1770_v45  ;;  %v709_v39 = vpop.f32.mrb[45].mxu0 }
 0x148   : > { %v900_v38 = vadd.f32 %v899_v36, %v1770_v45  ;;  %v901_v40 = vpop.f32.mrb[45].mxu1  ;;  %v710_v41 = vadd.f32 %v709_v39, %v1772_v46 }
 0x149   : > { %v902_v42 = vadd.f32 %v901_v40, %v1772_v46  ;;  %1003 = vst [vmem:[%s1778_s20 + $0x160] sm:$0xff] %v708_v37 }
 0x14a   : > { %1067 = vst [vmem:[%s1778_s20 + $0x360] sm:$0xff] %v900_v38  ;;  %1004 = vst.msk [vmem:[%s1778_s20 + $0x168] sm:$0xff] %vm959_vm1, %v710_v41  ;;  %v713_v43 = vpop.f32.mrb[46].mxu0 }
 0x14b   : > { %1068 = vst.msk [vmem:[%s1778_s20 + $0x368] sm:$0xff] %vm959_vm1, %v902_v42  ;;  %v905_v44 = vpop.f32.mrb[46].mxu1  ;;  %v714_v5 = vadd.f32 %v713_v43, %v1770_v45  ;;  %v715_v48 = vpop.f32.mrb[47].mxu0 }
 0x14c   : > { %v906_v47 = vadd.f32 %v905_v44, %v1770_v45  ;;  %v907_v49 = vpop.f32.mrb[47].mxu1  ;;  %v716_v50 = vadd.f32 %v715_v48, %v1772_v46 }
 0x14d   : > { %v908_v51 = vadd.f32 %v907_v49, %v1772_v46  ;;  %1005 = vst [vmem:[%s1778_s20 + $0x170] sm:$0xff] %v714_v5 }
 0x14e   : > { %1069 = vst [vmem:[%s1778_s20 + $0x370] sm:$0xff] %v906_v47  ;;  %1006 = vst.msk [vmem:[%s1778_s20 + $0x178] sm:$0xff] %vm959_vm1, %v716_v50  ;;  %v719_v52 = vpop.f32.mrb[48].mxu0 }
 0x14f   : > { %1070 = vst.msk [vmem:[%s1778_s20 + $0x378] sm:$0xff] %vm959_vm1, %v908_v51  ;;  %v911_v53 = vpop.f32.mrb[48].mxu1  ;;  %v720_v54 = vadd.f32 %v719_v52, %v1770_v45  ;;  %v721_v56 = vpop.f32.mrb[49].mxu0 }
 0x150   : > { %v912_v55 = vadd.f32 %v911_v53, %v1770_v45  ;;  %v913_v57 = vpop.f32.mrb[49].mxu1  ;;  %v722_v58 = vadd.f32 %v721_v56, %v1772_v46 }
 0x151   : > { %v914_v59 = vadd.f32 %v913_v57, %v1772_v46  ;;  %1007 = vst [vmem:[%s1778_s20 + $0x180] sm:$0xff] %v720_v54 }
 0x152   : > { %1071 = vst [vmem:[%s1778_s20 + $0x380] sm:$0xff] %v912_v55  ;;  %1008 = vst.msk [vmem:[%s1778_s20 + $0x188] sm:$0xff] %vm959_vm1, %v722_v58  ;;  %v725_v60 = vpop.f32.mrb[50].mxu0 }
 0x153   : > { %1072 = vst.msk [vmem:[%s1778_s20 + $0x388] sm:$0xff] %vm959_vm1, %v914_v59  ;;  %v917_v61 = vpop.f32.mrb[50].mxu1  ;;  %v726_v62 = vadd.f32 %v725_v60, %v1770_v45  ;;  %v727_v0 = vpop.f32.mrb[51].mxu0 }
 0x154   : > { %v918_v63 = vadd.f32 %v917_v61, %v1770_v45  ;;  %v919_v1 = vpop.f32.mrb[51].mxu1  ;;  %v728_v2 = vadd.f32 %v727_v0, %v1772_v46 }
 0x155   : > { %v920_v3 = vadd.f32 %v919_v1, %v1772_v46  ;;  %1009 = vst [vmem:[%s1778_s20 + $0x190] sm:$0xff] %v726_v62 }
 0x156   : > { %1073 = vst [vmem:[%s1778_s20 + $0x390] sm:$0xff] %v918_v63  ;;  %1010 = vst.msk [vmem:[%s1778_s20 + $0x198] sm:$0xff] %vm959_vm1, %v728_v2  ;;  %v731_v4 = vpop.f32.mrb[52].mxu0 }
 0x157   : > { %1074 = vst.msk [vmem:[%s1778_s20 + $0x398] sm:$0xff] %vm959_vm1, %v920_v3  ;;  %v923_v6 = vpop.f32.mrb[52].mxu1  ;;  %v732_v7 = vadd.f32 %v731_v4, %v1770_v45  ;;  %v733_v9 = vpop.f32.mrb[53].mxu0 }
 0x158   : > { %v924_v8 = vadd.f32 %v923_v6, %v1770_v45  ;;  %v925_v10 = vpop.f32.mrb[53].mxu1  ;;  %v734_v11 = vadd.f32 %v733_v9, %v1772_v46 }
 0x159   : > { %v926_v12 = vadd.f32 %v925_v10, %v1772_v46  ;;  %1011 = vst [vmem:[%s1778_s20 + $0x1a0] sm:$0xff] %v732_v7 }
 0x15a   : > { %1075 = vst [vmem:[%s1778_s20 + $0x3a0] sm:$0xff] %v924_v8  ;;  %1012 = vst.msk [vmem:[%s1778_s20 + $0x1a8] sm:$0xff] %vm959_vm1, %v734_v11  ;;  %v737_v13 = vpop.f32.mrb[54].mxu0 }
 0x15b   : > { %1076 = vst.msk [vmem:[%s1778_s20 + $0x3a8] sm:$0xff] %vm959_vm1, %v926_v12  ;;  %v929_v14 = vpop.f32.mrb[54].mxu1  ;;  %v738_v15 = vadd.f32 %v737_v13, %v1770_v45  ;;  %v739_v17 = vpop.f32.mrb[55].mxu0 }
 0x15c   : > { %v930_v16 = vadd.f32 %v929_v14, %v1770_v45  ;;  %v931_v18 = vpop.f32.mrb[55].mxu1  ;;  %v740_v19 = vadd.f32 %v739_v17, %v1772_v46 }
 0x15d   : > { %v932_v20 = vadd.f32 %v931_v18, %v1772_v46  ;;  %1013 = vst [vmem:[%s1778_s20 + $0x1b0] sm:$0xff] %v738_v15 }
 0x15e   : > { %1077 = vst [vmem:[%s1778_s20 + $0x3b0] sm:$0xff] %v930_v16  ;;  %1014 = vst.msk [vmem:[%s1778_s20 + $0x1b8] sm:$0xff] %vm959_vm1, %v740_v19  ;;  %v743_v21 = vpop.f32.mrb[56].mxu0 }
 0x15f   : > { %1078 = vst.msk [vmem:[%s1778_s20 + $0x3b8] sm:$0xff] %vm959_vm1, %v932_v20  ;;  %v935_v22 = vpop.f32.mrb[56].mxu1  ;;  %v744_v23 = vadd.f32 %v743_v21, %v1770_v45  ;;  %v745_v25 = vpop.f32.mrb[57].mxu0 }
 0x160   : > { %v936_v24 = vadd.f32 %v935_v22, %v1770_v45  ;;  %v937_v26 = vpop.f32.mrb[57].mxu1  ;;  %v746_v27 = vadd.f32 %v745_v25, %v1772_v46 }
 0x161   : > { %v938_v28 = vadd.f32 %v937_v26, %v1772_v46  ;;  %1015 = vst [vmem:[%s1778_s20 + $0x1c0] sm:$0xff] %v744_v23 }
 0x162   : > { %1079 = vst [vmem:[%s1778_s20 + $0x3c0] sm:$0xff] %v936_v24  ;;  %1016 = vst.msk [vmem:[%s1778_s20 + $0x1c8] sm:$0xff] %vm959_vm1, %v746_v27  ;;  %v749_v29 = vpop.f32.mrb[58].mxu0 }
 0x163   : > { %1080 = vst.msk [vmem:[%s1778_s20 + $0x3c8] sm:$0xff] %vm959_vm1, %v938_v28  ;;  %v941_v30 = vpop.f32.mrb[58].mxu1  ;;  %v750_v31 = vadd.f32 %v749_v29, %v1770_v45  ;;  %v751_v33 = vpop.f32.mrb[59].mxu0 }
 0x164   : > { %v942_v32 = vadd.f32 %v941_v30, %v1770_v45  ;;  %v943_v34 = vpop.f32.mrb[59].mxu1  ;;  %v752_v35 = vadd.f32 %v751_v33, %v1772_v46 }
 0x165   : > { %v944_v36 = vadd.f32 %v943_v34, %v1772_v46  ;;  %1017 = vst [vmem:[%s1778_s20 + $0x1d0] sm:$0xff] %v750_v31 }
 0x166   : > { %1081 = vst [vmem:[%s1778_s20 + $0x3d0] sm:$0xff] %v942_v32  ;;  %1018 = vst.msk [vmem:[%s1778_s20 + $0x1d8] sm:$0xff] %vm959_vm1, %v752_v35  ;;  %v755_v37 = vpop.f32.mrb[60].mxu0 }
 0x167   : > { %1082 = vst.msk [vmem:[%s1778_s20 + $0x3d8] sm:$0xff] %vm959_vm1, %v944_v36  ;;  %v947_v38 = vpop.f32.mrb[60].mxu1  ;;  %v756_v39 = vadd.f32 %v755_v37, %v1770_v45  ;;  %v757_v41 = vpop.f32.mrb[61].mxu0 }
 0x168   : > { %v948_v40 = vadd.f32 %v947_v38, %v1770_v45  ;;  %v949_v42 = vpop.f32.mrb[61].mxu1  ;;  %v758_v43 = vadd.f32 %v757_v41, %v1772_v46 }
 0x169   : > { %v950_v44 = vadd.f32 %v949_v42, %v1772_v46  ;;  %1019 = vst [vmem:[%s1778_s20 + $0x1e0] sm:$0xff] %v756_v39 }
 0x16a   : > { %1083 = vst [vmem:[%s1778_s20 + $0x3e0] sm:$0xff] %v948_v40  ;;  %1020 = vst.msk [vmem:[%s1778_s20 + $0x1e8] sm:$0xff] %vm959_vm1, %v758_v43  ;;  %v761_v5 = vpop.f32.mrb[62].mxu0 }
 0x16b   : > { %1084 = vst.msk [vmem:[%s1778_s20 + $0x3e8] sm:$0xff] %vm959_vm1, %v950_v44  ;;  %v953_v47 = vpop.f32.mrb[62].mxu1  ;;  %v762_v48 = vadd.f32 %v761_v5, %v1770_v45  ;;  %v763_v50 = vpop.f32.mrb[63].mxu0 }
 0x16c   : > { %v954_v49 = vadd.f32 %v953_v47, %v1770_v45  ;;  %v955_v51 = vpop.f32.mrb[63].mxu1  ;;  %v764_v52 = vadd.f32 %v763_v50, %v1772_v46 }
 0x16d   : > { %v956_v53 = vadd.f32 %v955_v51, %v1772_v46  ;;  %1021 = vst [vmem:[%s1778_s20 + $0x1f0] sm:$0xff] %v762_v48 }
 0x16e   : > { %1085 = vst [vmem:[%s1778_s20 + $0x3f0] sm:$0xff] %v954_v49  ;;  %1022 = vst.msk [vmem:[%s1778_s20 + $0x1f8] sm:$0xff] %vm959_vm1, %v764_v52 }
 0x16f   : > { %1086 = vst.msk [vmem:[%s1778_s20 + $0x3f8] sm:$0xff] %vm959_vm1, %v956_v53 }
 0x170   : > { %1463 = shalt.err (!%p1460_p3)
}
 0x171   : > { %s1464_s6 = scalar_lea.hbm %s2093_s27, 16384  ;;  %s1468_s9 = scalar_lea.hbm %s2151_s3, 32768 }
 0x172   : > { %p1465_p4 = scmp.ne.s32.totalorder %s2093_s27, %s1464_s6  ;;  %p1469_p9 = scmp.lt.u32.totalorder %s2093_s27, %s2151_s3 }
 0x173   : > { %p1470_p10 = scmp.lt.u32.totalorder %s1468_s9, %s1464_s6  ;;  %p1472_p12 = scmp.lt.u32.totalorder %s1464_s6, %s2093_s27 }
 0x174   : > { %p1466_p7 = pnand %p1465_p4, %p1576_p5 }
 0x175   : > { %p1471_p11 = por %p1470_p10, %p1469_p9 }
 0x176   : > { %p1467_p8 = pneg %p1466_p7 }
 0x177   : > { %p1473_p13 = por %p1472_p12, %p1471_p11 }
 0x179   : > { %p1474_p0 = pnand %p1473_p13, %p1467_p8 }
 0x17b   : > { %1477 = shalt.err (!%p1474_p0)
}
 0x17c   : > { %s1516_s17 = smov 256   ;;  %s1517_s19 = smov 16  }
 0x17d   : > { %1408 = dma.vmem_to_hbm [thread:$0]  (%p1576_p5), %s2095_s25, 16384, %s2093_s27, %s2107_s28, %s1516_s17, %s1516_s17, %s1517_s19  }
 0x17e PF: > { %p1414_p1 = scmp.ge.s32.totalorder %s1512_s15, 2  ;;  %s1117_s20 = sand.u32 1, %s1500_s12  }
 0x17f   : > { %s1118_s24 = scalar_lea.sflag [#allocation3], %s1117_s20 }
 0x180   : > { %p1411_p2 = pnand %p1414_p1, %p1580_p6 }
 0x182   : > { %1495 = dma.done.wait (!%p1411_p2), %s1118_s24, 16384  }
 0x183   : > { %1497 = vsyncadd (!%p1411_p2), %s1118_s24, 4294950912  ;;  %p13_p3 = scmp.ge.s32.totalorder %s1563_s18, 4   ;;  %s2154_s12 = smov %s1504_s13 }
 0x184   : > { %s2155_s13 = smov %s1508_s14  ;;  %s2156_s14 = smov %s1574_s21 }
 0x185   : > { %s2157_s15 = smov %s1563_s18  ;;  %15 = sbr.rel (!%p13_p3) target bundleno = 3 (0x3), region = 67 }
 0x18c   :  { %1123 = vsyncpa [#allocation3], 1 }
 0x18d   :  { %1125 = vsyncpa [#allocation3 + $0x1], 1 }

</bundles_post_ra>
